<compile_context>
chip_gen: v7x
topology: tpu7x:2x2x1
jax: 0.10.0
libtpu: 0.0.40
codegen_flags: <defaults>
</compile_context>

<pallas_src>
import jax
import jax.numpy as jnp
import numpy as np
from jax.experimental import pallas as pl
from jax.experimental.pallas import tpu as pltpu


def _round_up(x, m):
    return (x + m - 1) // m * m


def _pick_tile_b(n, per_item_bytes, target_bytes=4 << 20):
    """Images per grid step: big enough to amortize the ~0.35us/step overhead, small enough
    that double-buffered blocks stay well under VMEM (v7x: 32 MiB scoped default), and at
    least 2 grid steps when possible so v7x's two TensorCores both get work."""
    tb = max(1, min(n, target_bytes // max(per_item_bytes, 1)))
    if n >= 2:
        tb = min(tb, (n + 1) // 2)
    while n % tb:
        tb -= 1
    return tb


# ----------------------------------------------------------------------------- kernels --

def _conv_pool_kernel(p_ref, w_ref, b_ref, o_ref):
    """Fused 3x3 conv (phase im2col matmul) + 2x2 max-pool + bias + ReLU.

    p_ref: (TB, 4, HWp, K)  phase im2col patches, bf16.  HWp = padded pooled H*W, K = 9*Cin
    w_ref: (K, Cout)        conv weight, bf16
    b_ref: (1, Cout)        conv bias, f32
    o_ref: (TB, HWp, Cout)  pooled activation, f32
    """
    tb, nph, hwp, kk = p_ref.shape
    cout = w_ref.shape[1]
    p = p_ref[...].reshape(tb * nph * hwp, kk)        # 8-aligned collapse (hwp % 8 == 0)
    y = jnp.dot(p, w_ref[...], preferred_element_type=jnp.float32)
    y = y.reshape(tb, nph, hwp, cout)
    y = jnp.maximum(jnp.maximum(y[:, 0], y[:, 1]),    # max over the 4 pooling phases (VPU)
                    jnp.maximum(y[:, 2], y[:, 3]))
    o_ref[...] = jnp.maximum(y + b_ref[...], 0.0).astype(o_ref.dtype)


def _conv_pool_fc_kernel(p_ref, w_ref, b_ref, fcw_ref, fcb_ref, o_ref):
    """Conv+pool block (as above) fused with the final flatten + Linear classifier.

    fcw_ref: (HW, Cout, 10) classifier weight pre-permuted to (pooled pos, channel) order
    fcb_ref: (1, 10)
    o_ref:   (TB, 1, 10)    logits
    """
    tb, nph, hwp, kk = p_ref.shape
    cout = w_ref.shape[1]
    npos, _, nout = fcw_ref.shape
    p = p_ref[...].reshape(tb * nph * hwp, kk)
    y = jnp.dot(p, w_ref[...], preferred_element_type=jnp.float32)
    y = y.reshape(tb, nph, hwp, cout)
    y = jnp.maximum(jnp.maximum(y[:, 0], y[:, 1]),
                    jnp.maximum(y[:, 2], y[:, 3]))
    act = jnp.maximum(y + b_ref[...], 0.0).astype(fcw_ref.dtype)   # (TB, HWp, Cout) bf16
    logits = jnp.zeros((tb, nout), jnp.float32)
    for pos in range(npos):                  # 9 valid pooled positions (pad rows skipped)
        logits = logits + jnp.dot(act[:, pos, :], fcw_ref[pos],
                                  preferred_element_type=jnp.float32)
    o_ref[:, 0, :] = (logits + fcb_ref[...]).astype(o_ref.dtype)


def _linear_kernel(x_ref, w_ref, b_ref, o_ref):
    """o = x @ w + b  (aux-loss classifiers only)."""
    o_ref[...] = (jnp.dot(x_ref[...], w_ref[...], preferred_element_type=jnp.float32)
                  + b_ref[...]).astype(o_ref.dtype)


# ---------------------------------------------------------------------------- wrappers --

def _phase_patches(x_nhwc, hw_pad):
    """Layout glue (XLA): zero-pad + strided phase / im2col extraction.
    (N,H,W,Cin) -> (N, 4, hw_pad, 9*Cin), KK ordered [(dy,dx), cin]."""
    N, H, W, Cin = x_nhwc.shape
    Ho, Wo = H // 2, W // 2            # MaxPool2d(2,2) floor semantics
    HW, KK = Ho * Wo, 9 * Cin
    xp = jnp.pad(x_nhwc, ((0, 0), (1, 1), (1, 1), (0, 0)))
    phases = []
    for a in range(2):
        for b in range(2):
            taps = [xp[:, a + dy: a + dy + 2 * Ho: 2, b + dx: b + dx + 2 * Wo: 2, :]
                    for dy in range(3) for dx in range(3)]
            phases.append(jnp.stack(taps, axis=-2).reshape(N, HW, KK))
    p = jnp.stack(phases, axis=1)                       # (N, 4, HW, KK)
    return jnp.pad(p, ((0, 0), (0, 0), (0, hw_pad - HW), (0, 0)))


def _conv_inputs(x_nhwc, w_torch, b):
    N, H, W, Cin = x_nhwc.shape
    Cout = w_torch.shape[0]
    Ho, Wo = H // 2, W // 2
    HW, KK = Ho * Wo, 9 * Cin
    HWp = _round_up(HW, 8)
    p = _phase_patches(x_nhwc, HWp).astype(jnp.bfloat16)                     # bf16 operands
    w2 = jnp.transpose(w_torch, (2, 3, 1, 0)).reshape(KK, Cout).astype(jnp.bfloat16)
    b2 = b.reshape(1, Cout).astype(jnp.float32)
    tb = _pick_tile_b(N, 4 * HWp * KK * 2)
    return p, w2, b2, (N, Ho, Wo, HW, HWp, KK, Cout, tb)


def conv_relu_pool(x_nhwc, w_torch, b):
    """(N,H,W,Cin), (Cout,Cin,3,3), (Cout,) -> (N, H//2, W//2, Cout) in f32."""
    p, w2, b2, (N, Ho, Wo, HW, HWp, KK, Cout, tb) = _conv_inputs(x_nhwc, w_torch, b)
    out = pl.pallas_call(
        _conv_pool_kernel,
        out_shape=jax.ShapeDtypeStruct((N, HWp, Cout), jnp.float32),
        grid=(N // tb,),
        in_specs=[
            pl.BlockSpec((tb, 4, HWp, KK), lambda i: (i, 0, 0, 0)),
            pl.BlockSpec((KK, Cout), lambda i: (0, 0)),
            pl.BlockSpec((1, Cout), lambda i: (0, 0)),
        ],
        out_specs=pl.BlockSpec((tb, HWp, Cout), lambda i: (i, 0, 0)),
        compiler_params=pltpu.CompilerParams(dimension_semantics=("parallel",)),
    )(p, w2, b2)
    return out[:, :HW, :].reshape(N, Ho, Wo, Cout)


def conv_relu_pool_fc(x_nhwc, w_torch, b, fc_w, fc_b):
    """Last conv block fused with its Linear classifier -> (N, 10) logits in f32."""
    p, w2, b2, (N, Ho, Wo, HW, HWp, KK, Cout, tb) = _conv_inputs(x_nhwc, w_torch, b)
    nout = fc_w.shape[0]
    # PyTorch flattens (C, Ho, Wo); the kernel activation is [(pooled pos = i*Wo+j), channel].
    fcw = jnp.transpose(fc_w.reshape(nout, Cout, Ho, Wo), (2, 3, 1, 0))
    fcw = fcw.reshape(HW, Cout, nout).astype(jnp.bfloat16)
    fcb = fc_b.reshape(1, nout).astype(jnp.float32)
    out = pl.pallas_call(
        _conv_pool_fc_kernel,
        out_shape=jax.ShapeDtypeStruct((N, 1, nout), jnp.float32),
        grid=(N // tb,),
        in_specs=[
            pl.BlockSpec((tb, 4, HWp, KK), lambda i: (i, 0, 0, 0)),
            pl.BlockSpec((KK, Cout), lambda i: (0, 0)),
            pl.BlockSpec((1, Cout), lambda i: (0, 0)),
            pl.BlockSpec((HW, Cout, nout), lambda i: (0, 0, 0)),
            pl.BlockSpec((1, nout), lambda i: (0, 0)),
        ],
        out_specs=pl.BlockSpec((tb, 1, nout), lambda i: (i, 0, 0)),
        compiler_params=pltpu.CompilerParams(dimension_semantics=("parallel",)),
    )(p, w2, b2, fcw, fcb)
    return out.reshape(N, nout)


def linear(x, w_torch, b):
    """x: (N,F), w: (Out,F), b: (Out,) -> (N,Out).  Aux-loss classifiers only."""
    N, F = x.shape
    Out = w_torch.shape[0]
    return pl.pallas_call(
        _linear_kernel,
        out_shape=jax.ShapeDtypeStruct((N, Out), jnp.float32),
    )(x.astype(jnp.bfloat16), w_torch.T.astype(jnp.bfloat16),
      b.reshape(1, Out).astype(jnp.float32))


def mnist_classifier_forward(x_nchw, params, do_auxloss=False):
    """Mirrors MNISTClassifier.forward.  Returns a list of logits arrays."""
    # TODO(synk): propagate_gradients (tensor.detach) is training-only; it is a no-op here.
    x = jnp.transpose(x_nchw, (0, 2, 3, 1))                 # NCHW -> NHWC for the conv kernels
    outputs = []
    for i in range(2):
        x = conv_relu_pool(x, params[f"conv{i}_w"], params[f"conv{i}_b"])
        if do_auxloss:
            flat = jnp.transpose(x, (0, 3, 1, 2)).reshape(x.shape[0], -1)   # NCHW flatten order
            outputs.append(linear(flat, params[f"fc{i}_w"], params[f"fc{i}_b"]))
    # Third conv block fused with its classifier (classifiers[-1] == classifiers[2]).
    outputs.append(conv_relu_pool_fc(x, params["conv2_w"], params["conv2_b"],
                                     params["fc2_w"], params["fc2_b"]))
    return outputs


# ------------------------------------------------------------------------------- params --

def init_params(key):
    """Deterministic PyTorch-like (uniform +-1/sqrt(fan_in)) init for all layers."""
    conv_dims = [(1, 32), (32, 64), (64, 128)]
    fc_dims = [32 * 14 * 14, 64 * 7 * 7, 128 * 3 * 3]
    keys = jax.random.split(key, 12)
    params, ki = {}, 0
    for i, (cin, cout) in enumerate(conv_dims):
        bound = 1.0 / (cin * 9) ** 0.5
        params[f"conv{i}_w"] = jax.random.uniform(keys[ki], (cout, cin, 3, 3),
                                                  jnp.float32, -bound, bound); ki += 1
        params[f"conv{i}_b"] = jax.random.uniform(keys[ki], (cout,),
                                                  jnp.float32, -bound, bound); ki += 1
    for i, f in enumerate(fc_dims):
        bound = 1.0 / f ** 0.5
        params[f"fc{i}_w"] = jax.random.uniform(keys[ki], (10, f),
                                                jnp.float32, -bound, bound); ki += 1
        params[f"fc{i}_b"] = jax.random.uniform(keys[ki], (10,),
                                                jnp.float32, -bound, bound); ki += 1
    return params


# ---------------------------------------------------------------------------- reference --

def _reference_forward(x_nchw, params):
    """Pure-JAX reference for the default (do_auxloss=False) path.
    Uses bf16 matmul operands with f32 accumulation to match the kernel's numerics."""
    x = jnp.transpose(x_nchw, (0, 2, 3, 1))
    for i in range(3):
        w, b = params[f"conv{i}_w"], params[f"conv{i}_b"]
        y = jax.lax.conv_general_dilated(
            x.astype(jnp.bfloat16),
            jnp.transpose(w, (2, 3, 1, 0)).astype(jnp.bfloat16),
            window_strides=(1, 1), padding=((1, 1), (1, 1)),
            dimension_numbers=("NHWC", "HWIO", "NHWC"),
            preferred_element_type=jnp.float32)
        y = jnp.maximum(y + b, 0.0)
        N, H, W, C = y.shape
        Ho, Wo = H // 2, W // 2
        x = y[:, :2 * Ho, :2 * Wo, :].reshape(N, Ho, 2, Wo, 2, C).max(axis=(2, 4))
    flat = jnp.transpose(x, (0, 3, 1, 2)).reshape(x.shape[0], -1)
    return jnp.dot(flat.astype(jnp.bfloat16), params["fc2_w"].T.astype(jnp.bfloat16),
                   preferred_element_type=jnp.float32) + params["fc2_b"]


# --------------------------------------------------------------------------------- main --

if __name__ == "__main__":
    key = jax.random.PRNGKey(0)
    k_x, k_p = jax.random.split(key)
    # MNIST-style input; spatial size 28 is forced by the Linear(128*3*3, 10) classifier.
    x = jax.random.normal(k_x, (2, 1, 28, 28), jnp.float32)
    params = init_params(k_p)

    fwd = jax.jit(lambda inp: mnist_classifier_forward(inp, params, do_auxloss=False))
    outputs = fwd(x)
    outputs = [jax.block_until_ready(o) for o in outputs]
    assert outputs[-1].shape == (2, 10)

    ref = jax.block_until_ready(_reference_forward(x, params))
    np.testing.assert_allclose(np.asarray(outputs[-1]), np.asarray(ref),
                               rtol=5e-2, atol=5e-3)
    print("KERNEL_OK")
</pallas_src>

<mosaic_0001>
module attributes {stable_mosaic.version = 11 : i64} {
  func.func @_conv_pool_kernel(%arg0: i32, %arg1: memref<1x4x200x9xbf16, #tpu.memory_space<vmem>>, %arg2: memref<9x32xbf16, #tpu.memory_space<vmem>>, %arg3: memref<1x32xf32, #tpu.memory_space<vmem>>, %arg4: memref<1x200x32xf32, #tpu.memory_space<vmem>>) attributes {dimension_semantics = [#tpu.dimension_semantics<parallel>], iteration_bounds = array<i64: 2>, scalar_prefetch = 0 : i64, scratch_operands = 0 : i64, tpu.core_type = #tpu.core_type<tc>, window_params = [{transform_indices = @transform_0, window_bounds = array<i64: 1, 4, 200, 9>}, {pipeline_mode = #tpu.pipeline_mode<synchronous>, transform_indices = @transform_1, window_bounds = array<i64: 9, 32>}, {pipeline_mode = #tpu.pipeline_mode<synchronous>, transform_indices = @transform_2, window_bounds = array<i64: 1, 32>}, {transform_indices = @transform_3, window_bounds = array<i64: 1, 200, 32>}]} {
    %c0 = arith.constant 0 : index
    %c0_0 = arith.constant 0 : index
    %c0_1 = arith.constant 0 : index
    %c0_2 = arith.constant 0 : index
    %0 = vector.load %arg1[%c0, %c0_0, %c0_1, %c0_2] : memref<1x4x200x9xbf16, #tpu.memory_space<vmem>>, vector<1x4x200x9xbf16>
    %1 = vector.shape_cast %0 : vector<1x4x200x9xbf16> to vector<800x9xbf16>
    %c0_3 = arith.constant 0 : index
    %c0_4 = arith.constant 0 : index
    %2 = vector.load %arg2[%c0_3, %c0_4] : memref<9x32xbf16, #tpu.memory_space<vmem>>, vector<9x32xbf16>
    %cst = arith.constant dense<0.000000e+00> : vector<800x32xf32>
    %3 = tpu.matmul %1, %2, %cst {dimension_numbers = #tpu.dot_dimension_numbers<[1], [0], [0], [1], [0, 0, 1, 1], [], []>} : vector<800x9xbf16>, vector<9x32xbf16>, vector<800x32xf32> -> vector<800x32xf32>
    %4 = vector.shape_cast %3 : vector<800x32xf32> to vector<1x4x200x32xf32>
    %5 = vector.extract_strided_slice %4 {offsets = [0, 0, 0, 0], sizes = [1, 1, 200, 32], strides = [1, 1, 1, 1]} : vector<1x4x200x32xf32> to vector<1x1x200x32xf32>
    %6 = vector.shape_cast %5 : vector<1x1x200x32xf32> to vector<1x200x32xf32>
    %7 = vector.extract_strided_slice %4 {offsets = [0, 1, 0, 0], sizes = [1, 1, 200, 32], strides = [1, 1, 1, 1]} : vector<1x4x200x32xf32> to vector<1x1x200x32xf32>
    %8 = vector.shape_cast %7 : vector<1x1x200x32xf32> to vector<1x200x32xf32>
    %9 = arith.maximumf %6, %8 : vector<1x200x32xf32>
    %10 = vector.extract_strided_slice %4 {offsets = [0, 2, 0, 0], sizes = [1, 1, 200, 32], strides = [1, 1, 1, 1]} : vector<1x4x200x32xf32> to vector<1x1x200x32xf32>
    %11 = vector.shape_cast %10 : vector<1x1x200x32xf32> to vector<1x200x32xf32>
    %12 = vector.extract_strided_slice %4 {offsets = [0, 3, 0, 0], sizes = [1, 1, 200, 32], strides = [1, 1, 1, 1]} : vector<1x4x200x32xf32> to vector<1x1x200x32xf32>
    %13 = vector.shape_cast %12 : vector<1x1x200x32xf32> to vector<1x200x32xf32>
    %14 = arith.maximumf %11, %13 : vector<1x200x32xf32>
    %15 = arith.maximumf %9, %14 : vector<1x200x32xf32>
    %c0_5 = arith.constant 0 : index
    %c0_6 = arith.constant 0 : index
    %16 = vector.load %arg3[%c0_5, %c0_6] : memref<1x32xf32, #tpu.memory_space<vmem>>, vector<1x32xf32>
    %17 = vector.shape_cast %16 : vector<1x32xf32> to vector<1x1x32xf32>
    %18 = vector.broadcast %17 : vector<1x1x32xf32> to vector<1x200x32xf32>
    %19 = arith.addf %15, %18 : vector<1x200x32xf32>
    %cst_7 = arith.constant 0.000000e+00 : f32
    %20 = vector.broadcast %cst_7 : f32 to vector<1x200x32xf32>
    %21 = arith.maximumf %19, %20 : vector<1x200x32xf32>
    %c0_8 = arith.constant 0 : index
    %c0_9 = arith.constant 0 : index
    %c0_10 = arith.constant 0 : index
    %22 = vector.load %arg4[%c0_8, %c0_9, %c0_10] : memref<1x200x32xf32, #tpu.memory_space<vmem>>, vector<1x200x32xf32>
    tpu.vector_store %arg4[%c0_8, %c0_9, %c0_10], %21 {strides = array<i32>} : memref<1x200x32xf32, #tpu.memory_space<vmem>>, vector<1x200x32xf32>,
    return
  }
  func.func @transform_0(%arg0: i32) -> (i32, i32, i32, i32) {
    %c0_i32 = arith.constant 0 : i32
    %c0_i32_0 = arith.constant 0 : i32
    %c0_i32_1 = arith.constant 0 : i32
    %c0_i32_2 = arith.constant 0 : i32
    return %arg0, %c0_i32, %c0_i32_0, %c0_i32_1 : i32, i32, i32, i32
  }
  func.func @transform_1(%arg0: i32) -> (i32, i32) {
    %c0_i32 = arith.constant 0 : i32
    %c0_i32_0 = arith.constant 0 : i32
    %c0_i32_1 = arith.constant 0 : i32
    return %c0_i32, %c0_i32_0 : i32, i32
  }
  func.func @transform_2(%arg0: i32) -> (i32, i32) {
    %c0_i32 = arith.constant 0 : i32
    %c0_i32_0 = arith.constant 0 : i32
    %c0_i32_1 = arith.constant 0 : i32
    return %c0_i32, %c0_i32_0 : i32, i32
  }
  func.func @transform_3(%arg0: i32) -> (i32, i32, i32) {
    %c0_i32 = arith.constant 0 : i32
    %c0_i32_0 = arith.constant 0 : i32
    %c0_i32_1 = arith.constant 0 : i32
    return %arg0, %c0_i32, %c0_i32_0 : i32, i32, i32
  }
}

module attributes {stable_mosaic.version = 11 : i64} {
  func.func @_conv_pool_kernel(%arg0: i32, %arg1: memref<1x4x56x288xbf16, #tpu.memory_space<vmem>>, %arg2: memref<288x64xbf16, #tpu.memory_space<vmem>>, %arg3: memref<1x64xf32, #tpu.memory_space<vmem>>, %arg4: memref<1x56x64xf32, #tpu.memory_space<vmem>>) attributes {dimension_semantics = [#tpu.dimension_semantics<parallel>], iteration_bounds = array<i64: 2>, scalar_prefetch = 0 : i64, scratch_operands = 0 : i64, tpu.core_type = #tpu.core_type<tc>, window_params = [{transform_indices = @transform_0, window_bounds = array<i64: 1, 4, 56, 288>}, {pipeline_mode = #tpu.pipeline_mode<synchronous>, transform_indices = @transform_1, window_bounds = array<i64: 288, 64>}, {pipeline_mode = #tpu.pipeline_mode<synchronous>, transform_indices = @transform_2, window_bounds = array<i64: 1, 64>}, {transform_indices = @transform_3, window_bounds = array<i64: 1, 56, 64>}]} {
    %c0 = arith.constant 0 : index
    %c0_0 = arith.constant 0 : index
    %c0_1 = arith.constant 0 : index
    %c0_2 = arith.constant 0 : index
    %0 = vector.load %arg1[%c0, %c0_0, %c0_1, %c0_2] : memref<1x4x56x288xbf16, #tpu.memory_space<vmem>>, vector<1x4x56x288xbf16>
    %1 = vector.shape_cast %0 : vector<1x4x56x288xbf16> to vector<224x288xbf16>
    %c0_3 = arith.constant 0 : index
    %c0_4 = arith.constant 0 : index
    %2 = vector.load %arg2[%c0_3, %c0_4] : memref<288x64xbf16, #tpu.memory_space<vmem>>, vector<288x64xbf16>
    %cst = arith.constant dense<0.000000e+00> : vector<224x64xf32>
    %3 = tpu.matmul %1, %2, %cst {dimension_numbers = #tpu.dot_dimension_numbers<[1], [0], [0], [1], [0, 0, 1, 1], [], []>} : vector<224x288xbf16>, vector<288x64xbf16>, vector<224x64xf32> -> vector<224x64xf32>
    %4 = vector.shape_cast %3 : vector<224x64xf32> to vector<1x4x56x64xf32>
    %5 = vector.extract_strided_slice %4 {offsets = [0, 0, 0, 0], sizes = [1, 1, 56, 64], strides = [1, 1, 1, 1]} : vector<1x4x56x64xf32> to vector<1x1x56x64xf32>
    %6 = vector.shape_cast %5 : vector<1x1x56x64xf32> to vector<1x56x64xf32>
    %7 = vector.extract_strided_slice %4 {offsets = [0, 1, 0, 0], sizes = [1, 1, 56, 64], strides = [1, 1, 1, 1]} : vector<1x4x56x64xf32> to vector<1x1x56x64xf32>
    %8 = vector.shape_cast %7 : vector<1x1x56x64xf32> to vector<1x56x64xf32>
    %9 = arith.maximumf %6, %8 : vector<1x56x64xf32>
    %10 = vector.extract_strided_slice %4 {offsets = [0, 2, 0, 0], sizes = [1, 1, 56, 64], strides = [1, 1, 1, 1]} : vector<1x4x56x64xf32> to vector<1x1x56x64xf32>
    %11 = vector.shape_cast %10 : vector<1x1x56x64xf32> to vector<1x56x64xf32>
    %12 = vector.extract_strided_slice %4 {offsets = [0, 3, 0, 0], sizes = [1, 1, 56, 64], strides = [1, 1, 1, 1]} : vector<1x4x56x64xf32> to vector<1x1x56x64xf32>
    %13 = vector.shape_cast %12 : vector<1x1x56x64xf32> to vector<1x56x64xf32>
    %14 = arith.maximumf %11, %13 : vector<1x56x64xf32>
    %15 = arith.maximumf %9, %14 : vector<1x56x64xf32>
    %c0_5 = arith.constant 0 : index
    %c0_6 = arith.constant 0 : index
    %16 = vector.load %arg3[%c0_5, %c0_6] : memref<1x64xf32, #tpu.memory_space<vmem>>, vector<1x64xf32>
    %17 = vector.shape_cast %16 : vector<1x64xf32> to vector<1x1x64xf32>
    %18 = vector.broadcast %17 : vector<1x1x64xf32> to vector<1x56x64xf32>
    %19 = arith.addf %15, %18 : vector<1x56x64xf32>
    %cst_7 = arith.constant 0.000000e+00 : f32
    %20 = vector.broadcast %cst_7 : f32 to vector<1x56x64xf32>
    %21 = arith.maximumf %19, %20 : vector<1x56x64xf32>
    %c0_8 = arith.constant 0 : index
    %c0_9 = arith.constant 0 : index
    %c0_10 = arith.constant 0 : index
    %22 = vector.load %arg4[%c0_8, %c0_9, %c0_10] : memref<1x56x64xf32, #tpu.memory_space<vmem>>, vector<1x56x64xf32>
    tpu.vector_store %arg4[%c0_8, %c0_9, %c0_10], %21 {strides = array<i32>} : memref<1x56x64xf32, #tpu.memory_space<vmem>>, vector<1x56x64xf32>,
    return
  }
  func.func @transform_0(%arg0: i32) -> (i32, i32, i32, i32) {
    %c0_i32 = arith.constant 0 : i32
    %c0_i32_0 = arith.constant 0 : i32
    %c0_i32_1 = arith.constant 0 : i32
    %c0_i32_2 = arith.constant 0 : i32
    return %arg0, %c0_i32, %c0_i32_0, %c0_i32_1 : i32, i32, i32, i32
  }
  func.func @transform_1(%arg0: i32) -> (i32, i32) {
    %c0_i32 = arith.constant 0 : i32
    %c0_i32_0 = arith.constant 0 : i32
    %c0_i32_1 = arith.constant 0 : i32
    return %c0_i32, %c0_i32_0 : i32, i32
  }
  func.func @transform_2(%arg0: i32) -> (i32, i32) {
    %c0_i32 = arith.constant 0 : i32
    %c0_i32_0 = arith.constant 0 : i32
    %c0_i32_1 = arith.constant 0 : i32
    return %c0_i32, %c0_i32_0 : i32, i32
  }
  func.func @transform_3(%arg0: i32) -> (i32, i32, i32) {
    %c0_i32 = arith.constant 0 : i32
    %c0_i32_0 = arith.constant 0 : i32
    %c0_i32_1 = arith.constant 0 : i32
    return %arg0, %c0_i32, %c0_i32_0 : i32, i32, i32
  }
}

module attributes {stable_mosaic.version = 11 : i64} {
  func.func @_conv_pool_fc_kernel(%arg0: i32, %arg1: memref<1x4x16x576xbf16, #tpu.memory_space<vmem>>, %arg2: memref<576x128xbf16, #tpu.memory_space<vmem>>, %arg3: memref<1x128xf32, #tpu.memory_space<vmem>>, %arg4: memref<9x128x10xbf16, #tpu.memory_space<vmem>>, %arg5: memref<1x10xf32, #tpu.memory_space<vmem>>, %arg6: memref<1x1x10xf32, #tpu.memory_space<vmem>>) attributes {dimension_semantics = [#tpu.dimension_semantics<parallel>], iteration_bounds = array<i64: 2>, scalar_prefetch = 0 : i64, scratch_operands = 0 : i64, tpu.core_type = #tpu.core_type<tc>, window_params = [{transform_indices = @transform_0, window_bounds = array<i64: 1, 4, 16, 576>}, {pipeline_mode = #tpu.pipeline_mode<synchronous>, transform_indices = @transform_1, window_bounds = array<i64: 576, 128>}, {pipeline_mode = #tpu.pipeline_mode<synchronous>, transform_indices = @transform_2, window_bounds = array<i64: 1, 128>}, {pipeline_mode = #tpu.pipeline_mode<synchronous>, transform_indices = @transform_3, window_bounds = array<i64: 9, 128, 10>}, {pipeline_mode = #tpu.pipeline_mode<synchronous>, transform_indices = @transform_4, window_bounds = array<i64: 1, 10>}, {transform_indices = @transform_5, window_bounds = array<i64: 1, 1, 10>}]} {
    %c0 = arith.constant 0 : index
    %c0_0 = arith.constant 0 : index
    %c0_1 = arith.constant 0 : index
    %c0_2 = arith.constant 0 : index
    %0 = vector.load %arg1[%c0, %c0_0, %c0_1, %c0_2] : memref<1x4x16x576xbf16, #tpu.memory_space<vmem>>, vector<1x4x16x576xbf16>
    %1 = vector.shape_cast %0 : vector<1x4x16x576xbf16> to vector<64x576xbf16>
    %c0_3 = arith.constant 0 : index
    %c0_4 = arith.constant 0 : index
    %2 = vector.load %arg2[%c0_3, %c0_4] : memref<576x128xbf16, #tpu.memory_space<vmem>>, vector<576x128xbf16>
    %cst = arith.constant dense<0.000000e+00> : vector<64x128xf32>
    %3 = tpu.matmul %1, %2, %cst {dimension_numbers = #tpu.dot_dimension_numbers<[1], [0], [0], [1], [0, 0, 1, 1], [], []>} : vector<64x576xbf16>, vector<576x128xbf16>, vector<64x128xf32> -> vector<64x128xf32>
    %4 = vector.shape_cast %3 : vector<64x128xf32> to vector<1x4x16x128xf32>
    %5 = vector.extract_strided_slice %4 {offsets = [0, 0, 0, 0], sizes = [1, 1, 16, 128], strides = [1, 1, 1, 1]} : vector<1x4x16x128xf32> to vector<1x1x16x128xf32>
    %6 = vector.shape_cast %5 : vector<1x1x16x128xf32> to vector<1x16x128xf32>
    %7 = vector.extract_strided_slice %4 {offsets = [0, 1, 0, 0], sizes = [1, 1, 16, 128], strides = [1, 1, 1, 1]} : vector<1x4x16x128xf32> to vector<1x1x16x128xf32>
    %8 = vector.shape_cast %7 : vector<1x1x16x128xf32> to vector<1x16x128xf32>
    %9 = arith.maximumf %6, %8 : vector<1x16x128xf32>
    %10 = vector.extract_strided_slice %4 {offsets = [0, 2, 0, 0], sizes = [1, 1, 16, 128], strides = [1, 1, 1, 1]} : vector<1x4x16x128xf32> to vector<1x1x16x128xf32>
    %11 = vector.shape_cast %10 : vector<1x1x16x128xf32> to vector<1x16x128xf32>
    %12 = vector.extract_strided_slice %4 {offsets = [0, 3, 0, 0], sizes = [1, 1, 16, 128], strides = [1, 1, 1, 1]} : vector<1x4x16x128xf32> to vector<1x1x16x128xf32>
    %13 = vector.shape_cast %12 : vector<1x1x16x128xf32> to vector<1x16x128xf32>
    %14 = arith.maximumf %11, %13 : vector<1x16x128xf32>
    %15 = arith.maximumf %9, %14 : vector<1x16x128xf32>
    %c0_5 = arith.constant 0 : index
    %c0_6 = arith.constant 0 : index
    %16 = vector.load %arg3[%c0_5, %c0_6] : memref<1x128xf32, #tpu.memory_space<vmem>>, vector<1x128xf32>
    %17 = vector.shape_cast %16 : vector<1x128xf32> to vector<1x1x128xf32>
    %18 = vector.broadcast %17 : vector<1x1x128xf32> to vector<1x16x128xf32>
    %19 = arith.addf %15, %18 : vector<1x16x128xf32>
    %cst_7 = arith.constant 0.000000e+00 : f32
    %20 = vector.broadcast %cst_7 : f32 to vector<1x16x128xf32>
    %21 = arith.maximumf %19, %20 : vector<1x16x128xf32>
    %22 = arith.truncf %21 : vector<1x16x128xf32> to vector<1x16x128xbf16>
    %cst_8 = arith.constant 0.000000e+00 : f32
    %23 = vector.broadcast %cst_8 : f32 to vector<1x10xf32>
    %24 = vector.extract_strided_slice %22 {offsets = [0, 0, 0], sizes = [1, 1, 128], strides = [1, 1, 1]} : vector<1x16x128xbf16> to vector<1x1x128xbf16>
    %25 = vector.shape_cast %24 : vector<1x1x128xbf16> to vector<1x128xbf16>
    %c0_9 = arith.constant 0 : index
    %c0_10 = arith.constant 0 : index
    %c0_11 = arith.constant 0 : index
    %26 = vector.load %arg4[%c0_9, %c0_10, %c0_11] : memref<9x128x10xbf16, #tpu.memory_space<vmem>>, vector<1x128x10xbf16>
    %27 = vector.shape_cast %26 : vector<1x128x10xbf16> to vector<128x10xbf16>
    %cst_12 = arith.constant dense<0.000000e+00> : vector<1x10xf32>
    %28 = tpu.matmul %25, %27, %cst_12 {dimension_numbers = #tpu.dot_dimension_numbers<[1], [0], [0], [1], [0, 0, 1, 1], [], []>} : vector<1x128xbf16>, vector<128x10xbf16>, vector<1x10xf32> -> vector<1x10xf32>
    %29 = arith.addf %23, %28 : vector<1x10xf32>
    %30 = vector.extract_strided_slice %22 {offsets = [0, 1, 0], sizes = [1, 1, 128], strides = [1, 1, 1]} : vector<1x16x128xbf16> to vector<1x1x128xbf16>
    %31 = vector.shape_cast %30 : vector<1x1x128xbf16> to vector<1x128xbf16>
    %c1 = arith.constant 1 : index
    %c0_13 = arith.constant 0 : index
    %c0_14 = arith.constant 0 : index
    %32 = vector.load %arg4[%c1, %c0_13, %c0_14] : memref<9x128x10xbf16, #tpu.memory_space<vmem>>, vector<1x128x10xbf16>
    %33 = vector.shape_cast %32 : vector<1x128x10xbf16> to vector<128x10xbf16>
    %cst_15 = arith.constant dense<0.000000e+00> : vector<1x10xf32>
    %34 = tpu.matmul %31, %33, %cst_15 {dimension_numbers = #tpu.dot_dimension_numbers<[1], [0], [0], [1], [0, 0, 1, 1], [], []>} : vector<1x128xbf16>, vector<128x10xbf16>, vector<1x10xf32> -> vector<1x10xf32>
    %35 = arith.addf %29, %34 : vector<1x10xf32>
    %36 = vector.extract_strided_slice %22 {offsets = [0, 2, 0], sizes = [1, 1, 128], strides = [1, 1, 1]} : vector<1x16x128xbf16> to vector<1x1x128xbf16>
    %37 = vector.shape_cast %36 : vector<1x1x128xbf16> to vector<1x128xbf16>
    %c2 = arith.constant 2 : index
    %c0_16 = arith.constant 0 : index
    %c0_17 = arith.constant 0 : index
    %38 = vector.load %arg4[%c2, %c0_16, %c0_17] : memref<9x128x10xbf16, #tpu.memory_space<vmem>>, vector<1x128x10xbf16>
    %39 = vector.shape_cast %38 : vector<1x128x10xbf16> to vector<128x10xbf16>
    %cst_18 = arith.constant dense<0.000000e+00> : vector<1x10xf32>
    %40 = tpu.matmul %37, %39, %cst_18 {dimension_numbers = #tpu.dot_dimension_numbers<[1], [0], [0], [1], [0, 0, 1, 1], [], []>} : vector<1x128xbf16>, vector<128x10xbf16>, vector<1x10xf32> -> vector<1x10xf32>
    %41 = arith.addf %35, %40 : vector<1x10xf32>
    %42 = vector.extract_strided_slice %22 {offsets = [0, 3, 0], sizes = [1, 1, 128], strides = [1, 1, 1]} : vector<1x16x128xbf16> to vector<1x1x128xbf16>
    %43 = vector.shape_cast %42 : vector<1x1x128xbf16> to vector<1x128xbf16>
    %c3 = arith.constant 3 : index
    %c0_19 = arith.constant 0 : index
    %c0_20 = arith.constant 0 : index
    %44 = vector.load %arg4[%c3, %c0_19, %c0_20] : memref<9x128x10xbf16, #tpu.memory_space<vmem>>, vector<1x128x10xbf16>
    %45 = vector.shape_cast %44 : vector<1x128x10xbf16> to vector<128x10xbf16>
    %cst_21 = arith.constant dense<0.000000e+00> : vector<1x10xf32>
    %46 = tpu.matmul %43, %45, %cst_21 {dimension_numbers = #tpu.dot_dimension_numbers<[1], [0], [0], [1], [0, 0, 1, 1], [], []>} : vector<1x128xbf16>, vector<128x10xbf16>, vector<1x10xf32> -> vector<1x10xf32>
    %47 = arith.addf %41, %46 : vector<1x10xf32>
    %48 = vector.extract_strided_slice %22 {offsets = [0, 4, 0], sizes = [1, 1, 128], strides = [1, 1, 1]} : vector<1x16x128xbf16> to vector<1x1x128xbf16>
    %49 = vector.shape_cast %48 : vector<1x1x128xbf16> to vector<1x128xbf16>
    %c4 = arith.constant 4 : index
    %c0_22 = arith.constant 0 : index
    %c0_23 = arith.constant 0 : index
    %50 = vector.load %arg4[%c4, %c0_22, %c0_23] : memref<9x128x10xbf16, #tpu.memory_space<vmem>>, vector<1x128x10xbf16>
    %51 = vector.shape_cast %50 : vector<1x128x10xbf16> to vector<128x10xbf16>
    %cst_24 = arith.constant dense<0.000000e+00> : vector<1x10xf32>
    %52 = tpu.matmul %49, %51, %cst_24 {dimension_numbers = #tpu.dot_dimension_numbers<[1], [0], [0], [1], [0, 0, 1, 1], [], []>} : vector<1x128xbf16>, vector<128x10xbf16>, vector<1x10xf32> -> vector<1x10xf32>
    %53 = arith.addf %47, %52 : vector<1x10xf32>
    %54 = vector.extract_strided_slice %22 {offsets = [0, 5, 0], sizes = [1, 1, 128], strides = [1, 1, 1]} : vector<1x16x128xbf16> to vector<1x1x128xbf16>
    %55 = vector.shape_cast %54 : vector<1x1x128xbf16> to vector<1x128xbf16>
    %c5 = arith.constant 5 : index
    %c0_25 = arith.constant 0 : index
    %c0_26 = arith.constant 0 : index
    %56 = vector.load %arg4[%c5, %c0_25, %c0_26] : memref<9x128x10xbf16, #tpu.memory_space<vmem>>, vector<1x128x10xbf16>
    %57 = vector.shape_cast %56 : vector<1x128x10xbf16> to vector<128x10xbf16>
    %cst_27 = arith.constant dense<0.000000e+00> : vector<1x10xf32>
    %58 = tpu.matmul %55, %57, %cst_27 {dimension_numbers = #tpu.dot_dimension_numbers<[1], [0], [0], [1], [0, 0, 1, 1], [], []>} : vector<1x128xbf16>, vector<128x10xbf16>, vector<1x10xf32> -> vector<1x10xf32>
    %59 = arith.addf %53, %58 : vector<1x10xf32>
    %60 = vector.extract_strided_slice %22 {offsets = [0, 6, 0], sizes = [1, 1, 128], strides = [1, 1, 1]} : vector<1x16x128xbf16> to vector<1x1x128xbf16>
    %61 = vector.shape_cast %60 : vector<1x1x128xbf16> to vector<1x128xbf16>
    %c6 = arith.constant 6 : index
    %c0_28 = arith.constant 0 : index
    %c0_29 = arith.constant 0 : index
    %62 = vector.load %arg4[%c6, %c0_28, %c0_29] : memref<9x128x10xbf16, #tpu.memory_space<vmem>>, vector<1x128x10xbf16>
    %63 = vector.shape_cast %62 : vector<1x128x10xbf16> to vector<128x10xbf16>
    %cst_30 = arith.constant dense<0.000000e+00> : vector<1x10xf32>
    %64 = tpu.matmul %61, %63, %cst_30 {dimension_numbers = #tpu.dot_dimension_numbers<[1], [0], [0], [1], [0, 0, 1, 1], [], []>} : vector<1x128xbf16>, vector<128x10xbf16>, vector<1x10xf32> -> vector<1x10xf32>
    %65 = arith.addf %59, %64 : vector<1x10xf32>
    %66 = vector.extract_strided_slice %22 {offsets = [0, 7, 0], sizes = [1, 1, 128], strides = [1, 1, 1]} : vector<1x16x128xbf16> to vector<1x1x128xbf16>
    %67 = vector.shape_cast %66 : vector<1x1x128xbf16> to vector<1x128xbf16>
    %c7 = arith.constant 7 : index
    %c0_31 = arith.constant 0 : index
    %c0_32 = arith.constant 0 : index
    %68 = vector.load %arg4[%c7, %c0_31, %c0_32] : memref<9x128x10xbf16, #tpu.memory_space<vmem>>, vector<1x128x10xbf16>
    %69 = vector.shape_cast %68 : vector<1x128x10xbf16> to vector<128x10xbf16>
    %cst_33 = arith.constant dense<0.000000e+00> : vector<1x10xf32>
    %70 = tpu.matmul %67, %69, %cst_33 {dimension_numbers = #tpu.dot_dimension_numbers<[1], [0], [0], [1], [0, 0, 1, 1], [], []>} : vector<1x128xbf16>, vector<128x10xbf16>, vector<1x10xf32> -> vector<1x10xf32>
    %71 = arith.addf %65, %70 : vector<1x10xf32>
    %72 = vector.extract_strided_slice %22 {offsets = [0, 8, 0], sizes = [1, 1, 128], strides = [1, 1, 1]} : vector<1x16x128xbf16> to vector<1x1x128xbf16>
    %73 = vector.shape_cast %72 : vector<1x1x128xbf16> to vector<1x128xbf16>
    %c8 = arith.constant 8 : index
    %c0_34 = arith.constant 0 : index
    %c0_35 = arith.constant 0 : index
    %74 = vector.load %arg4[%c8, %c0_34, %c0_35] : memref<9x128x10xbf16, #tpu.memory_space<vmem>>, vector<1x128x10xbf16>
    %75 = vector.shape_cast %74 : vector<1x128x10xbf16> to vector<128x10xbf16>
    %cst_36 = arith.constant dense<0.000000e+00> : vector<1x10xf32>
    %76 = tpu.matmul %73, %75, %cst_36 {dimension_numbers = #tpu.dot_dimension_numbers<[1], [0], [0], [1], [0, 0, 1, 1], [], []>} : vector<1x128xbf16>, vector<128x10xbf16>, vector<1x10xf32> -> vector<1x10xf32>
    %77 = arith.addf %71, %76 : vector<1x10xf32>
    %c0_37 = arith.constant 0 : index
    %c0_38 = arith.constant 0 : index
    %78 = vector.load %arg5[%c0_37, %c0_38] : memref<1x10xf32, #tpu.memory_space<vmem>>, vector<1x10xf32>
    %79 = arith.addf %77, %78 : vector<1x10xf32>
    %c0_39 = arith.constant 0 : index
    %c0_40 = arith.constant 0 : index
    %c0_41 = arith.constant 0 : index
    %80 = vector.load %arg6[%c0_39, %c0_40, %c0_41] : memref<1x1x10xf32, #tpu.memory_space<vmem>>, vector<1x1x10xf32>
    %81 = vector.shape_cast %80 : vector<1x1x10xf32> to vector<1x10xf32>
    %82 = vector.shape_cast %79 : vector<1x10xf32> to vector<1x1x10xf32>
    tpu.vector_store %arg6[%c0_39, %c0_40, %c0_41], %82 {strides = array<i32>} : memref<1x1x10xf32, #tpu.memory_space<vmem>>, vector<1x1x10xf32>,
    return
  }
  func.func @transform_0(%arg0: i32) -> (i32, i32, i32, i32) {
    %c0_i32 = arith.constant 0 : i32
    %c0_i32_0 = arith.constant 0 : i32
    %c0_i32_1 = arith.constant 0 : i32
    %c0_i32_2 = arith.constant 0 : i32
    return %arg0, %c0_i32, %c0_i32_0, %c0_i32_1 : i32, i32, i32, i32
  }
  func.func @transform_1(%arg0: i32) -> (i32, i32) {
    %c0_i32 = arith.constant 0 : i32
    %c0_i32_0 = arith.constant 0 : i32
    %c0_i32_1 = arith.constant 0 : i32
    return %c0_i32, %c0_i32_0 : i32, i32
  }
  func.func @transform_2(%arg0: i32) -> (i32, i32) {
    %c0_i32 = arith.constant 0 : i32
    %c0_i32_0 = arith.constant 0 : i32
    %c0_i32_1 = arith.constant 0 : i32
    return %c0_i32, %c0_i32_0 : i32, i32
  }
  func.func @transform_3(%arg0: i32) -> (i32, i32, i32) {
    %c0_i32 = arith.constant 0 : i32
    %c0_i32_0 = arith.constant 0 : i32
    %c0_i32_1 = arith.constant 0 : i32
    %c0_i32_2 = arith.constant 0 : i32
    return %c0_i32, %c0_i32_0, %c0_i32_1 : i32, i32, i32
  }
  func.func @transform_4(%arg0: i32) -> (i32, i32) {
    %c0_i32 = arith.constant 0 : i32
    %c0_i32_0 = arith.constant 0 : i32
    %c0_i32_1 = arith.constant 0 : i32
    return %c0_i32, %c0_i32_0 : i32, i32
  }
  func.func @transform_5(%arg0: i32) -> (i32, i32, i32) {
    %c0_i32 = arith.constant 0 : i32
    %c0_i32_0 = arith.constant 0 : i32
    %c0_i32_1 = arith.constant 0 : i32
    return %arg0, %c0_i32, %c0_i32_0 : i32, i32, i32
  }
}

</mosaic_0001>

<bundles_post_ra>
// kernel: _lambda_.3
= control target key start
LH: loop header
LB: loop body
LE: loop exit
PB: predicated region body
PF: predicated region fallthrough
CT: control target
= control target key end

     0   :  { %s1690_s12 = smov 0   ;;  %s2057_s0 = inlined_call_operand.vmem [shape: bf16[2,4,200,9], index: 0, kind: input, shape index: {}]   ;;  %s2058_s1 = inlined_call_operand.vmem [shape: bf16[9,32], index: 1, kind: input, shape index: {}]   ;;  %s2059_s2 = inlined_call_operand.vmem [shape: f32[1,32], index: 2, kind: input, shape index: {}]   ;;  %s2060_s3 = inlined_call_operand.vmem [shape: f32[2,200,32], index: 3, kind: output, shape index: {}]  }
   0x1 LB: > { %s1333_s13 = sadd.s32 4294967295, %s1667_s12   ;;  %p1337_p0 = scmp.ge.s32.totalorder %s1667_s12, 1  ;;  %s1667_s12 = sphi %s1690_s12, %s13_s12  }
   0x2   : > { %p137_p1 = scmp.lt.s32.totalorder %s1667_s12, 3 }
   0x4   : > { %p138_p2 = pnand %p1337_p0, %p137_p1 }
   0x6   : > { %141 = sbr.rel (%p138_p2) target bundleno = 342 (0x156), region = 32 }
   0xd   : > { %v1610_v0 = vld [vmem:[%s2058_s1] sm:$0x1f]   ;;  %vm680_vm0 = vcmask 1043456   ;;  %vm681_vm1 = vcmask 1044480   ;;  %p161_p3 = scmp.lt.s32.totalorder %s1333_s13, 1  ;;  %v1669_v1 = vmov 65535  }
   0xe   : > { %v682_v2 = vsel %vm680_vm0, 4294967295, %v1669_v1  ;;  %vm529_vm2 = vcmask 72704   ;;  %vm1252_vm3 = vcmask 261120  }
   0xf   : > { %v683_v3 = vsel %vm681_vm1, %v682_v2, 0  ;;  %s2072_s13 = smov (!%p161_p3, %s1333_s13), 1 }
  0x10   : > { %v685_v4 = vand.u32 %v1610_v0, %v683_v3  ;;  %s1599_s16 = smul.u32 400, %s2072_s13 }
  0x11   : > { %s1600_s20 = smul.u32 200, %s2072_s13 }
  0x12   : > { %1495 = vmatprep.subr.bf16.mxu0 %v685_v4  ;;  %1597 = vmatprep.subr.bf16.mxu1 %v685_v4  ;;  %s1707_s19 = scalar_lea.vmem %s2057_s0, %s1599_s16 }
  0x13   : > { %1496 = vmatpush3.bf16.msra.mxu0 %v685_v4  ;;  %1598 = vmatpush3.bf16.msra.mxu1 %v685_v4  ;;  %v1611_v5 = vld [vmem:[%s1707_s19] sm:$0xff]   ;;  %v1612_v6 = vld [vmem:[%s1707_s19 + $0xd0] sm:$0xff]   ;;  %v1613_v7 = vld [vmem:[%s1707_s19 + $0x8] sm:$0xff]   ;;  %s1929_s25 = scalar_lea.vmem %s2060_s3, %s1600_s20 }
  0x14   : > { %1497 = vmatprep.mubr.msk.bf16.mxu0 %vm529_vm2, %v1611_v5  ;;  %1549 = vmatprep.mubr.msk.bf16.mxu1 %vm529_vm2, %v1612_v6  ;;  %v1614_v8 = vld [vmem:[%s1707_s19 + $0xd8] sm:$0xff]   ;;  %v1615_v9 = vld [vmem:[%s1707_s19 + $0x10] sm:$0xff]   ;;  %v1616_v10 = vld [vmem:[%s1707_s19 + $0xe0] sm:$0xff]  }
  0x15   : > { %v1617_v11 = vld [vmem:[%s1707_s19 + $0x18] sm:$0xff]   ;;  %v1618_v12 = vld [vmem:[%s1707_s19 + $0xe8] sm:$0xff]   ;;  %v1619_v13 = vld [vmem:[%s1707_s19 + $0x20] sm:$0xff]  }
  0x16   : > { %1498 = vmatmul.mubr.msk.bf16.vlgmr.msra.gmra.mrb[0].mxu0 %vm529_vm2, %v1613_v7  ;;  %1550 = vmatmul.mubr.msk.bf16.vlgmr.msra.gmra.mrb[0].mxu1 %vm529_vm2, %v1614_v8  ;;  %v1620_v14 = vld [vmem:[%s1707_s19 + $0xf0] sm:$0xff]   ;;  %v1621_v15 = vld [vmem:[%s1707_s19 + $0x28] sm:$0xff]   ;;  %v1622_v16 = vld [vmem:[%s1707_s19 + $0xf8] sm:$0xff]  }
  0x17   : > { %1501 = vmatprep.mubr.msk.bf16.mxu0 %vm529_vm2, %v1615_v9  ;;  %1553 = vmatprep.mubr.msk.bf16.mxu1 %vm529_vm2, %v1616_v10  ;;  %v1623_v17 = vld [vmem:[%s1707_s19 + $0x30] sm:$0xff]   ;;  %v1624_v18 = vld [vmem:[%s1707_s19 + $0x100] sm:$0xff]   ;;  %v1625_v19 = vld [vmem:[%s1707_s19 + $0x38] sm:$0xff]  }
  0x18   : > { %v1626_v20 = vld [vmem:[%s1707_s19 + $0x108] sm:$0xff]   ;;  %v1627_v21 = vld [vmem:[%s1707_s19 + $0x40] sm:$0xff]   ;;  %v1628_v22 = vld [vmem:[%s1707_s19 + $0x110] sm:$0xff]  }
  0x19   : > { %v1629_v23 = vld [vmem:[%s1707_s19 + $0x48] sm:$0xff]   ;;  %v1630_v24 = vld [vmem:[%s1707_s19 + $0x118] sm:$0xff]   ;;  %v1631_v25 = vld [vmem:[%s1707_s19 + $0x50] sm:$0xff]  }
  0x1a   : > { %v1632_v26 = vld [vmem:[%s1707_s19 + $0x120] sm:$0xff]   ;;  %v1633_v27 = vld [vmem:[%s1707_s19 + $0x58] sm:$0xff]   ;;  %v1634_v28 = vld [vmem:[%s1707_s19 + $0x128] sm:$0xff]  }
  0x1b   : > { %v1635_v29 = vld [vmem:[%s1707_s19 + $0x60] sm:$0xff]   ;;  %v1636_v30 = vld [vmem:[%s1707_s19 + $0x130] sm:$0xff]   ;;  %v1637_v31 = vld [vmem:[%s1707_s19 + $0x68] sm:$0xff]  }
  0x1c   : > { %v1638_v32 = vld [vmem:[%s1707_s19 + $0x138] sm:$0xff]   ;;  %v1639_v33 = vld [vmem:[%s1707_s19 + $0x70] sm:$0xff]   ;;  %v1640_v34 = vld [vmem:[%s1707_s19 + $0x140] sm:$0xff]  }
  0x1d   : > { %v1641_v35 = vld [vmem:[%s1707_s19 + $0x78] sm:$0xff]   ;;  %v1642_v36 = vld [vmem:[%s1707_s19 + $0x148] sm:$0xff]   ;;  %v1643_v37 = vld [vmem:[%s1707_s19 + $0x80] sm:$0xff]  }
  0x1e   : > { %1502 = vmatmul.mubr.msk.bf16.gmra.mrb[4].mxu0 %vm529_vm2, %v1617_v11  ;;  %1554 = vmatmul.mubr.msk.bf16.gmra.mrb[4].mxu1 %vm529_vm2, %v1618_v12  ;;  %v1644_v38 = vld [vmem:[%s1707_s19 + $0x150] sm:$0xff]   ;;  %v1645_v39 = vld [vmem:[%s1707_s19 + $0x88] sm:$0xff]   ;;  %v1646_v40 = vld [vmem:[%s1707_s19 + $0x158] sm:$0xff]  }
  0x1f   : > { %1505 = vmatprep.mubr.msk.bf16.mxu0 %vm529_vm2, %v1619_v13  ;;  %1557 = vmatprep.mubr.msk.bf16.mxu1 %vm529_vm2, %v1620_v14  ;;  %v1647_v41 = vld [vmem:[%s1707_s19 + $0x90] sm:$0xff]   ;;  %v1648_v42 = vld [vmem:[%s1707_s19 + $0x160] sm:$0xff]   ;;  %v1649_v43 = vld [vmem:[%s1707_s19 + $0x98] sm:$0xff]  }
  0x20   : > { %v1650_v44 = vld [vmem:[%s1707_s19 + $0x168] sm:$0xff]   ;;  %v1651_v45 = vld [vmem:[%s1707_s19 + $0xa0] sm:$0xff]   ;;  %v1652_v46 = vld [vmem:[%s1707_s19 + $0x170] sm:$0xff]  }
  0x21   : > { %v1653_v47 = vld [vmem:[%s1707_s19 + $0xa8] sm:$0xff]   ;;  %v1654_v48 = vld [vmem:[%s1707_s19 + $0x178] sm:$0xff]   ;;  %v1655_v49 = vld [vmem:[%s1707_s19 + $0xb0] sm:$0xff]  }
  0x22   : > { %v1656_v50 = vld [vmem:[%s1707_s19 + $0x180] sm:$0xff]   ;;  %v1657_v51 = vld [vmem:[%s1707_s19 + $0xb8] sm:$0xff]   ;;  %v1658_v52 = vld [vmem:[%s1707_s19 + $0x188] sm:$0xff]  }
  0x23   : > { %v1659_v53 = vld [vmem:[%s1707_s19 + $0xc0] sm:$0xff]   ;;  %v1660_v54 = vld [vmem:[%s1707_s19 + $0xc8] sm:$0xff]  }
  0x26   : > { %1506 = vmatmul.mubr.msk.bf16.gmra.mrb[8].mxu0 %vm529_vm2, %v1621_v15  ;;  %1558 = vmatmul.mubr.msk.bf16.gmra.mrb[8].mxu1 %vm529_vm2, %v1622_v16 }
  0x27   : > { %1509 = vmatprep.mubr.msk.bf16.mxu0 %vm529_vm2, %v1623_v17  ;;  %1561 = vmatprep.mubr.msk.bf16.mxu1 %vm529_vm2, %v1624_v18 }
  0x2e   : > { %1510 = vmatmul.mubr.msk.bf16.gmra.mrb[12].mxu0 %vm529_vm2, %v1625_v19  ;;  %1562 = vmatmul.mubr.msk.bf16.gmra.mrb[12].mxu1 %vm529_vm2, %v1626_v20 }
  0x2f   : > { %1513 = vmatprep.mubr.msk.bf16.mxu0 %vm529_vm2, %v1627_v21  ;;  %1565 = vmatprep.mubr.msk.bf16.mxu1 %vm529_vm2, %v1628_v22 }
  0x36   : > { %1514 = vmatmul.mubr.msk.bf16.gmra.mrb[16].mxu0 %vm529_vm2, %v1629_v23  ;;  %1566 = vmatmul.mubr.msk.bf16.gmra.mrb[16].mxu1 %vm529_vm2, %v1630_v24 }
  0x37   : > { %1517 = vmatprep.mubr.msk.bf16.mxu0 %vm529_vm2, %v1631_v25  ;;  %1569 = vmatprep.mubr.msk.bf16.mxu1 %vm529_vm2, %v1632_v26 }
  0x3e   : > { %1518 = vmatmul.mubr.msk.bf16.gmra.mrb[20].mxu0 %vm529_vm2, %v1633_v27  ;;  %1570 = vmatmul.mubr.msk.bf16.gmra.mrb[20].mxu1 %vm529_vm2, %v1634_v28 }
  0x3f   : > { %1521 = vmatprep.mubr.msk.bf16.mxu0 %vm529_vm2, %v1635_v29  ;;  %1573 = vmatprep.mubr.msk.bf16.mxu1 %vm529_vm2, %v1636_v30 }
  0x46   : > { %1522 = vmatmul.mubr.msk.bf16.gmra.mrb[24].mxu0 %vm529_vm2, %v1637_v31  ;;  %1574 = vmatmul.mubr.msk.bf16.gmra.mrb[24].mxu1 %vm529_vm2, %v1638_v32 }
  0x47   : > { %1525 = vmatprep.mubr.msk.bf16.mxu0 %vm529_vm2, %v1639_v33  ;;  %1577 = vmatprep.mubr.msk.bf16.mxu1 %vm529_vm2, %v1640_v34 }
  0x4e   : > { %1526 = vmatmul.mubr.msk.bf16.gmra.mrb[28].mxu0 %vm529_vm2, %v1641_v35  ;;  %1578 = vmatmul.mubr.msk.bf16.gmra.mrb[28].mxu1 %vm529_vm2, %v1642_v36 }
  0x4f   : > { %1529 = vmatprep.mubr.msk.bf16.mxu0 %vm529_vm2, %v1643_v37  ;;  %1581 = vmatprep.mubr.msk.bf16.mxu1 %vm529_vm2, %v1644_v38 }
  0x56   : > { %1530 = vmatmul.mubr.msk.bf16.gmra.mrb[32].mxu0 %vm529_vm2, %v1645_v39  ;;  %1582 = vmatmul.mubr.msk.bf16.gmra.mrb[32].mxu1 %vm529_vm2, %v1646_v40 }
  0x57   : > { %1533 = vmatprep.mubr.msk.bf16.mxu0 %vm529_vm2, %v1647_v41  ;;  %1585 = vmatprep.mubr.msk.bf16.mxu1 %vm529_vm2, %v1648_v42 }
  0x5e   : > { %1534 = vmatmul.mubr.msk.bf16.gmra.mrb[36].mxu0 %vm529_vm2, %v1649_v43  ;;  %1586 = vmatmul.mubr.msk.bf16.gmra.mrb[36].mxu1 %vm529_vm2, %v1650_v44 }
  0x5f   : > { %1537 = vmatprep.mubr.msk.bf16.mxu0 %vm529_vm2, %v1651_v45  ;;  %1589 = vmatprep.mubr.msk.bf16.mxu1 %vm529_vm2, %v1652_v46 }
  0x66   : > { %1538 = vmatmul.mubr.msk.bf16.gmra.mrb[40].mxu0 %vm529_vm2, %v1653_v47  ;;  %1590 = vmatmul.mubr.msk.bf16.gmra.mrb[40].mxu1 %vm529_vm2, %v1654_v48 }
  0x67   : > { %1541 = vmatprep.mubr.msk.bf16.mxu0 %vm529_vm2, %v1655_v49  ;;  %1593 = vmatprep.mubr.msk.bf16.mxu1 %vm529_vm2, %v1656_v50 }
  0x6e   : > { %1542 = vmatmul.mubr.msk.bf16.gmra.mrb[44].mxu0 %vm529_vm2, %v1657_v51  ;;  %1594 = vmatmul.mubr.msk.bf16.gmra.mrb[44].mxu1 %vm529_vm2, %v1658_v52 }
  0x6f   : > { %1545 = vmatprep.mubr.msk.bf16.mxu0 %vm529_vm2, %v1659_v53  ;;  %v1922_v53 = vld [vmem:[%s2059_s2] ss:$0 sm:$0xff] }
  0x76   : > { %1546 = vmatmul.mubr.msk.bf16.gmra.mrb[48].mxu0 %vm529_vm2, %v1660_v54 }
  0xe9   : > { %v1809_v55 = vpop.f32.mrb[0].mxu0  ;;  %v1813_v57 = vpop.f32.mrb[0].mxu1 }
  0xea   : > { %v1811_v56 = vpop.f32.mrb[1].mxu0  ;;  %v929_v59 = vpop.f32.mrb[1].mxu1 }
  0xeb   : > { %v1815_v58 = vpop.f32.mrb[2].mxu0  ;;  %v1819_v61 = vpop.f32.mrb[2].mxu1 }
  0xec   : > { %v1817_v60 = vpop.f32.mrb[3].mxu0  ;;  %v1821_v62 = vpop.f32.mrb[3].mxu1 }
  0xed   : > { %2063 = vst [vmem:[#allocation2_spill] sm:$0xff] %v1817_v60 }
  0xf1   : > { %v1823_v63 = vpop.f32.mrb[4].mxu0  ;;  %v1827_v1 = vpop.f32.mrb[4].mxu1 }
  0xf2   : > { %v1825_v0 = vpop.f32.mrb[5].mxu0  ;;  %v1831_v3 = vpop.f32.mrb[5].mxu1 }
  0xf3   : > { %v1829_v2 = vpop.f32.mrb[6].mxu0  ;;  %v1835_v5 = vpop.f32.mrb[6].mxu1 }
  0xf4   : > { %v1833_v4 = vpop.f32.mrb[7].mxu0  ;;  %v1837_v6 = vpop.f32.mrb[7].mxu1 }
  0xf9   : > { %v1839_v7 = vpop.f32.mrb[8].mxu0  ;;  %v1843_v9 = vpop.f32.mrb[8].mxu1 }
  0xfa   : > { %v1841_v8 = vpop.f32.mrb[9].mxu0  ;;  %v1847_v11 = vpop.f32.mrb[9].mxu1 }
  0xfb   : > { %v1845_v10 = vpop.f32.mrb[10].mxu0  ;;  %v1851_v13 = vpop.f32.mrb[10].mxu1 }
  0xfc   : > { %v1849_v12 = vpop.f32.mrb[11].mxu0  ;;  %v1853_v14 = vpop.f32.mrb[11].mxu1 }
 0x101   : > { %v1855_v15 = vpop.f32.mrb[12].mxu0  ;;  %v1859_v17 = vpop.f32.mrb[12].mxu1 }
 0x102   : > { %v1857_v16 = vpop.f32.mrb[13].mxu0  ;;  %v1863_v19 = vpop.f32.mrb[13].mxu1 }
 0x103   : > { %v1861_v18 = vpop.f32.mrb[14].mxu0  ;;  %v1867_v21 = vpop.f32.mrb[14].mxu1 }
 0x104   : > { %v1865_v20 = vpop.f32.mrb[15].mxu0  ;;  %v1869_v22 = vpop.f32.mrb[15].mxu1 }
 0x109   : > { %v1871_v23 = vpop.f32.mrb[16].mxu0  ;;  %v1875_v25 = vpop.f32.mrb[16].mxu1 }
 0x10a   : > { %v1873_v24 = vpop.f32.mrb[17].mxu0  ;;  %v1879_v27 = vpop.f32.mrb[17].mxu1 }
 0x10b   : > { %v1877_v26 = vpop.f32.mrb[18].mxu0  ;;  %v1883_v29 = vpop.f32.mrb[18].mxu1 }
 0x10c   : > { %v1881_v28 = vpop.f32.mrb[19].mxu0  ;;  %v1885_v30 = vpop.f32.mrb[19].mxu1 }
 0x111   : > { %v1887_v31 = vpop.f32.mrb[20].mxu0  ;;  %v1891_v33 = vpop.f32.mrb[20].mxu1 }
 0x112   : > { %v1889_v32 = vpop.f32.mrb[21].mxu0  ;;  %v1895_v35 = vpop.f32.mrb[21].mxu1 }
 0x113   : > { %v1893_v34 = vpop.f32.mrb[22].mxu0  ;;  %v1899_v37 = vpop.f32.mrb[22].mxu1 }
 0x114   : > { %v1897_v36 = vpop.f32.mrb[23].mxu0  ;;  %v1901_v38 = vpop.f32.mrb[23].mxu1 }
 0x119   : > { %v1903_v39 = vpop.f32.mrb[24].mxu0  ;;  %v1575_v41 = vpop.f32.mrb[24].mxu1 }
 0x11a   : > { %2064 = vst [vmem:[#allocation3_spill] sm:$0xff] %v1903_v39  ;;  %v1907_v42 = vpop.f32.mrb[25].mxu0  ;;  %v1148_v43 = vmax.f32 %v1821_v62, %v1575_v41  ;;  %v1910_v44 = vpop.f32.mrb[25].mxu1 }
 0x11b   : > { %2065 = vst [vmem:[#allocation4_spill] sm:$0xff] %v1907_v42  ;;  %v1524_v45 = vpop.f32.mrb[26].mxu0  ;;  %v1576_v47 = vpop.f32.mrb[26].mxu1 }
 0x11c   : > { %v1122_v46 = vmax.f32 %v1809_v55, %v1524_v45  ;;  %v1913_v48 = vpop.f32.mrb[27].mxu0  ;;  %v1149_v49 = vmax.f32 %v1813_v57, %v1576_v47  ;;  %v1028_v51 = vpop.f32.mrb[27].mxu1 }
 0x11d   : > { %v1147_v52 = vmax.f32 %v929_v59, %v1028_v51 }
 0x11f   : > { %v1172_v54 = vmax.f32 %v1122_v46, %v1147_v52 }
 0x121   : > { %v1527_v62 = vpop.f32.mrb[28].mxu0  ;;  %v1204_v55 = vadd.f32 %v1922_v53, %v1172_v54  ;;  %v1579_v45 = vpop.f32.mrb[28].mxu1 }
 0x122   : > { %v1125_v41 = vmax.f32 %v1833_v4, %v1527_v62  ;;  %v833_v40 = vpop.f32.mrb[29].mxu0  ;;  %v1152_v57 = vmax.f32 %v1837_v6, %v1579_v45  ;;  %v1041_v47 = vpop.f32.mrb[29].mxu1 }
 0x123   : > { %v1123_v59 = vmax.f32 %v1815_v58, %v833_v40  ;;  %v1528_v46 = vpop.f32.mrb[30].mxu0  ;;  %v1229_v51 = vmax.f32 %v1204_v55, 0.0  ;;  %v1150_v52 = vmax.f32 %v1819_v61, %v1041_v47  ;;  %v1580_v54 = vpop.f32.mrb[30].mxu1 }
 0x124   : > { %v1126_v4 = vmax.f32 %v1823_v63, %v1528_v46  ;;  %v836_v62 = vpop.f32.mrb[31].mxu0  ;;  %v1153_v39 = vmax.f32 %v1827_v1, %v1580_v54  ;;  %v1044_v42 = vpop.f32.mrb[31].mxu1 }
 0x125   : > { %v1173_v50 = vmax.f32 %v1123_v59, %v1148_v43  ;;  %v1124_v60 = vmax.f32 %v1825_v0, %v836_v62  ;;  %1255 = vst.msk [vmem:[%s1929_s25 + $0x10] sm:$0xff] %vm1252_vm3, %v1229_v51  ;;  %v1175_v6 = vmax.f32 %v1125_v41, %v1150_v52  ;;  %v1151_v58 = vmax.f32 %v1831_v3, %v1044_v42 }
 0x127   : > { %v1205_v40 = vadd.f32 %v1922_v53, %v1173_v50  ;;  %v1174_v55 = vmax.f32 %v1124_v60, %v1149_v49  ;;  %v1207_v61 = vadd.f32 %v1922_v53, %v1175_v6  ;;  %v1176_v63 = vmax.f32 %v1126_v4, %v1151_v58 }
 0x129   : > { %v1230_v45 = vmax.f32 %v1205_v40, 0.0  ;;  %v1206_v43 = vadd.f32 %v1922_v53, %v1174_v55  ;;  %v1531_v1 = vpop.f32.mrb[32].mxu0  ;;  %v1232_v59 = vmax.f32 %v1207_v61, 0.0  ;;  %v1208_v0 = vadd.f32 %v1922_v53, %v1176_v63  ;;  %v1583_v41 = vpop.f32.mrb[32].mxu1 }
 0x12a   : > { %v1129_v47 = vmax.f32 %v1849_v12, %v1531_v1  ;;  %v849_v46 = vpop.f32.mrb[33].mxu0  ;;  %v1156_v60 = vmax.f32 %v1853_v14, %v1583_v41  ;;  %v1057_v49 = vpop.f32.mrb[33].mxu1 }
 0x12b   : > { %1256 = vst.msk [vmem:[%s1929_s25 + $0x18] sm:$0xff] %vm1252_vm3, %v1230_v45  ;;  %v1231_v3 = vmax.f32 %v1206_v43, 0.0  ;;  %v1127_v42 = vmax.f32 %v1829_v2, %v849_v46  ;;  %v1532_v50 = vpop.f32.mrb[34].mxu0  ;;  %1258 = vst.msk [vmem:[%s1929_s25 + $0x28] sm:$0xff] %vm1252_vm3, %v1232_v59  ;;  %v1233_v51 = vmax.f32 %v1208_v0, 0.0  ;;  %v1154_v52 = vmax.f32 %v1835_v5, %v1057_v49  ;;  %v1584_v12 = vpop.f32.mrb[34].mxu1 }
 0x12c   : > { %v1130_v4 = vmax.f32 %v1839_v7, %v1532_v50  ;;  %v852_v54 = vpop.f32.mrb[35].mxu0  ;;  %v1157_v6 = vmax.f32 %v1843_v9, %v1584_v12  ;;  %v1060_v58 = vpop.f32.mrb[35].mxu1 }
 0x12d   : > { %1257 = vst.msk [vmem:[%s1929_s25 + $0x20] sm:$0xff] %vm1252_vm3, %v1231_v3  ;;  %v1177_v62 = vmax.f32 %v1127_v42, %v1152_v57  ;;  %v1128_v14 = vmax.f32 %v1841_v8, %v852_v54  ;;  %1259 = vst.msk [vmem:[%s1929_s25 + $0x30] sm:$0xff] %vm1252_vm3, %v1233_v51  ;;  %v1179_v2 = vmax.f32 %v1129_v47, %v1154_v52 }
 0x12e   : > { %v1155_v40 = vmax.f32 %v1847_v11, %v1060_v58 }
 0x12f   : > { %v1209_v5 = vadd.f32 %v1922_v53, %v1177_v62  ;;  %v1178_v55 = vmax.f32 %v1128_v14, %v1153_v39  ;;  %v1211_v7 = vadd.f32 %v1922_v53, %v1179_v2 }
 0x130   : > { %v1180_v61 = vmax.f32 %v1130_v4, %v1155_v40 }
 0x131   : > { %v1234_v63 = vmax.f32 %v1209_v5, 0.0  ;;  %v1210_v57 = vadd.f32 %v1922_v53, %v1178_v55  ;;  %v1535_v9 = vpop.f32.mrb[36].mxu0  ;;  %v1236_v45 = vmax.f32 %v1211_v7, 0.0  ;;  %v1587_v1 = vpop.f32.mrb[36].mxu1 }
 0x132   : > { %v1212_v8 = vadd.f32 %v1922_v53, %v1180_v61  ;;  %v1133_v43 = vmax.f32 %v1865_v20, %v1535_v9  ;;  %v865_v59 = vpop.f32.mrb[37].mxu0  ;;  %v1160_v39 = vmax.f32 %v1869_v22, %v1587_v1  ;;  %v1073_v47 = vpop.f32.mrb[37].mxu1 }
 0x133   : > { %1260 = vst.msk [vmem:[%s1929_s25 + $0x38] sm:$0xff] %vm1252_vm3, %v1234_v63  ;;  %v1235_v11 = vmax.f32 %v1210_v57, 0.0  ;;  %v1131_v0 = vmax.f32 %v1845_v10, %v865_v59  ;;  %v1536_v41 = vpop.f32.mrb[38].mxu0  ;;  %1262 = vst.msk [vmem:[%s1929_s25 + $0x48] sm:$0xff] %vm1252_vm3, %v1236_v45  ;;  %v1158_v3 = vmax.f32 %v1851_v13, %v1073_v47  ;;  %v1588_v20 = vpop.f32.mrb[38].mxu1 }
 0x134   : > { %v1237_v46 = vmax.f32 %v1212_v8, 0.0  ;;  %v1134_v42 = vmax.f32 %v1855_v15, %v1536_v41  ;;  %v868_v49 = vpop.f32.mrb[39].mxu0  ;;  %v1161_v51 = vmax.f32 %v1859_v17, %v1588_v20  ;;  %v1076_v52 = vpop.f32.mrb[39].mxu1 }
 0x135   : > { %1261 = vst.msk [vmem:[%s1929_s25 + $0x40] sm:$0xff] %vm1252_vm3, %v1235_v11  ;;  %v1181_v50 = vmax.f32 %v1131_v0, %v1156_v60  ;;  %v1132_v22 = vmax.f32 %v1857_v16, %v868_v49  ;;  %v1183_v10 = vmax.f32 %v1133_v43, %v1158_v3  ;;  %v1159_v4 = vmax.f32 %v1863_v19, %v1076_v52 }
 0x136   : > { %1263 = vst.msk [vmem:[%s1929_s25 + $0x50] sm:$0xff] %vm1252_vm3, %v1237_v46 }
 0x137   : > { %v1213_v13 = vadd.f32 %v1922_v53, %v1181_v50  ;;  %v1182_v12 = vmax.f32 %v1132_v22, %v1157_v6  ;;  %v1215_v15 = vadd.f32 %v1922_v53, %v1183_v10  ;;  %v1184_v54 = vmax.f32 %v1134_v42, %v1159_v4 }
 0x139   : > { %v1238_v62 = vmax.f32 %v1213_v13, 0.0  ;;  %v1214_v60 = vadd.f32 %v1922_v53, %v1182_v12  ;;  %v1539_v17 = vpop.f32.mrb[40].mxu0  ;;  %v1240_v14 = vmax.f32 %v1215_v15, 0.0  ;;  %v1216_v16 = vadd.f32 %v1922_v53, %v1184_v54  ;;  %v1591_v2 = vpop.f32.mrb[40].mxu1 }
 0x13a   : > { %v1137_v58 = vmax.f32 %v1881_v28, %v1539_v17  ;;  %v881_v40 = vpop.f32.mrb[41].mxu0  ;;  %v1164_v6 = vmax.f32 %v1885_v30, %v1591_v2  ;;  %v1089_v55 = vpop.f32.mrb[41].mxu1 }
 0x13b   : > { %1264 = vst.msk [vmem:[%s1929_s25 + $0x58] sm:$0xff] %vm1252_vm3, %v1238_v62  ;;  %v1239_v19 = vmax.f32 %v1214_v60, 0.0  ;;  %v1135_v5 = vmax.f32 %v1861_v18, %v881_v40  ;;  %v1540_v7 = vpop.f32.mrb[42].mxu0  ;;  %1266 = vst.msk [vmem:[%s1929_s25 + $0x68] sm:$0xff] %vm1252_vm3, %v1240_v14  ;;  %v1241_v61 = vmax.f32 %v1216_v16, 0.0  ;;  %v1162_v63 = vmax.f32 %v1867_v21, %v1089_v55  ;;  %v1592_v28 = vpop.f32.mrb[42].mxu1 }
 0x13c   : > { %v1138_v57 = vmax.f32 %v1871_v23, %v1540_v7  ;;  %v884_v9 = vpop.f32.mrb[43].mxu0  ;;  %v1165_v8 = vmax.f32 %v1875_v25, %v1592_v28  ;;  %v1092_v43 = vpop.f32.mrb[43].mxu1  ;;  %v2069_v28 = vld [vmem:[#allocation3_spill] sm:$0xff] }
 0x13d   : > { %1265 = vst.msk [vmem:[%s1929_s25 + $0x60] sm:$0xff] %vm1252_vm3, %v1239_v19  ;;  %v1185_v45 = vmax.f32 %v1135_v5, %v1160_v39  ;;  %v1136_v30 = vmax.f32 %v1873_v24, %v884_v9  ;;  %1267 = vst.msk [vmem:[%s1929_s25 + $0x70] sm:$0xff] %vm1252_vm3, %v1241_v61  ;;  %v1187_v18 = vmax.f32 %v1137_v58, %v1162_v63  ;;  %v2067_v61 = vld [vmem:[#allocation4_spill] sm:$0xff] }
 0x13e   : > { %v1163_v1 = vmax.f32 %v1879_v27, %v1092_v43 }
 0x13f   : > { %v1217_v21 = vadd.f32 %v1922_v53, %v1185_v45  ;;  %v1186_v59 = vmax.f32 %v1136_v30, %v1161_v51  ;;  %v1219_v23 = vadd.f32 %v1922_v53, %v1187_v18 }
 0x140   : > { %v1188_v11 = vmax.f32 %v1138_v57, %v1163_v1  ;;  %v2068_v57 = vld [vmem:[#allocation2_spill] sm:$0xff] }
 0x141   : > { %v1242_v0 = vmax.f32 %v1217_v21, 0.0  ;;  %v1218_v39 = vadd.f32 %v1922_v53, %v1186_v59  ;;  %v1543_v25 = vpop.f32.mrb[44].mxu0  ;;  %v1244_v47 = vmax.f32 %v1219_v23, 0.0  ;;  %v1595_v46 = vpop.f32.mrb[44].mxu1 }
 0x142   : > { %v1220_v24 = vadd.f32 %v1922_v53, %v1188_v11  ;;  %v1141_v41 = vmax.f32 %v1897_v36, %v1543_v25  ;;  %v897_v3 = vpop.f32.mrb[45].mxu0  ;;  %v1168_v42 = vmax.f32 %v1901_v38, %v1595_v46  ;;  %v1105_v49 = vpop.f32.mrb[45].mxu1 }
 0x143   : > { %1268 = vst.msk [vmem:[%s1929_s25 + $0x78] sm:$0xff] %vm1252_vm3, %v1242_v0  ;;  %v1243_v27 = vmax.f32 %v1218_v39, 0.0  ;;  %v1139_v20 = vmax.f32 %v1877_v26, %v897_v3  ;;  %v1544_v50 = vpop.f32.mrb[46].mxu0  ;;  %1270 = vst.msk [vmem:[%s1929_s25 + $0x88] sm:$0xff] %vm1252_vm3, %v1244_v47  ;;  %v1166_v22 = vmax.f32 %v1883_v29, %v1105_v49  ;;  %v1596_v36 = vpop.f32.mrb[46].mxu1 }
 0x144   : > { %v1245_v51 = vmax.f32 %v1220_v24, 0.0  ;;  %v1142_v52 = vmax.f32 %v1887_v31, %v1544_v50  ;;  %v900_v10 = vpop.f32.mrb[47].mxu0  ;;  %v1169_v13 = vmax.f32 %v1891_v33, %v1596_v36  ;;  %v1108_v26 = vpop.f32.mrb[47].mxu1 }
 0x145   : > { %1269 = vst.msk [vmem:[%s1929_s25 + $0x80] sm:$0xff] %vm1252_vm3, %v1243_v27  ;;  %v1189_v4 = vmax.f32 %v1139_v20, %v1164_v6  ;;  %v1140_v38 = vmax.f32 %v1889_v32, %v900_v10  ;;  %v1191_v12 = vmax.f32 %v1141_v41, %v1166_v22  ;;  %v1167_v15 = vmax.f32 %v1895_v35, %v1108_v26 }
 0x146   : > { %1271 = vst.msk [vmem:[%s1929_s25 + $0x90] sm:$0xff] %vm1252_vm3, %v1245_v51  ;;  %v2066_v6 = vmax.f32 %v1811_v56, %v1913_v48  ;;  %v2070_v56 = vmax.f32 %v2068_v57, %v2069_v28 }
 0x147   : > { %v1221_v29 = vadd.f32 %v1922_v53, %v1189_v4  ;;  %v1190_v31 = vmax.f32 %v1140_v38, %v1165_v8  ;;  %v1223_v54 = vadd.f32 %v1922_v53, %v1191_v12  ;;  %v1192_v62 = vmax.f32 %v1142_v52, %v1167_v15 }
 0x149   : > { %v1246_v60 = vmax.f32 %v1221_v29, 0.0  ;;  %v1222_v33 = vadd.f32 %v1922_v53, %v1190_v31  ;;  %v1547_v17 = vpop.f32.mrb[48].mxu0  ;;  %v1248_v32 = vmax.f32 %v1223_v54, 0.0  ;;  %v1224_v14 = vadd.f32 %v1922_v53, %v1192_v62 }
 0x14a   : > { %v1145_v16 = vmax.f32 %v1547_v17, %v1899_v37  ;;  %v913_v58 = vpop.f32.mrb[49].mxu0 }
 0x14b   : > { %1272 = vst.msk [vmem:[%s1929_s25 + $0x98] sm:$0xff] %vm1252_vm3, %v1246_v60  ;;  %v1247_v35 = vmax.f32 %v1222_v33, 0.0  ;;  %v1143_v2 = vmax.f32 %v1893_v34, %v913_v58  ;;  %v1548_v40 = vpop.f32.mrb[50].mxu0  ;;  %1274 = vst.msk [vmem:[%s1929_s25 + $0xa8] sm:$0xff] %vm1252_vm3, %v1248_v32  ;;  %v1249_v19 = vmax.f32 %v1224_v14, 0.0 }
 0x14c   : > { %v1170_v5 = vmax.f32 %v2066_v6, %v1145_v16  ;;  %v1146_v55 = vmax.f32 %v1548_v40, %v1910_v44  ;;  %v916_v7 = vpop.f32.mrb[51].mxu0 }
 0x14d   : > { %1273 = vst.msk [vmem:[%s1929_s25 + $0xa0] sm:$0xff] %vm1252_vm3, %v1247_v35  ;;  %v1193_v37 = vmax.f32 %v1143_v2, %v1168_v42  ;;  %v1144_v34 = vmax.f32 %v2067_v61, %v916_v7  ;;  %1275 = vst.msk [vmem:[%s1929_s25 + $0xb0] sm:$0xff] %vm1252_vm3, %v1249_v19 }
 0x14e   : > { %v1202_v63 = vadd.f32 %v1922_v53, %v1170_v5  ;;  %v1171_v48 = vmax.f32 %v2070_v56, %v1146_v55 }
 0x14f   : > { %v1225_v9 = vadd.f32 %v1922_v53, %v1193_v37  ;;  %v1194_v44 = vmax.f32 %v1144_v34, %v1169_v13 }
 0x150   : > { %v1227_v45 = vmax.f32 %v1202_v63, 0.0  ;;  %v1203_v8 = vadd.f32 %v1922_v53, %v1171_v48 }
 0x151   : > { %v1250_v30 = vmax.f32 %v1225_v9, 0.0  ;;  %v1226_v43 = vadd.f32 %v1922_v53, %v1194_v44 }
 0x152   : > { %1253 = vst.msk [vmem:[%s1929_s25] sm:$0xff] %vm1252_vm3, %v1227_v45  ;;  %v1228_v18 = vmax.f32 %v1203_v8, 0.0 }
 0x153   : > { %1276 = vst.msk [vmem:[%s1929_s25 + $0xb8] sm:$0xff] %vm1252_vm3, %v1250_v30  ;;  %v1251_v1 = vmax.f32 %v1226_v43, 0.0 }
 0x154   : > { %1254 = vst.msk [vmem:[%s1929_s25 + $0x8] sm:$0xff] %vm1252_vm3, %v1228_v18 }
 0x155   : > { %1277 = vst.msk [vmem:[%s1929_s25 + $0xc0] sm:$0xff] %vm1252_vm3, %v1251_v1 }
 0x156 PF: > { %s13_s12 = sadd.s32 1, %s1667_s12  }
 0x157   : > { %p10_p4 = scmp.ge.s32.totalorder %s13_s12, 4  }
 0x159   :  { %12 = sbr.rel (!%p10_p4) target bundleno = 1 (0x1), region = 62 }

// kernel: _lambda_.4
= control target key start
LH: loop header
LB: loop body
LE: loop exit
PB: predicated region body
PF: predicated region fallthrough
CT: control target
= control target key end

     0   :  { %s1380_s12 = smov 0   ;;  %s1604_s0 = inlined_call_operand.vmem [shape: bf16[2,4,56,288], index: 0, kind: input, shape index: {}]   ;;  %s1605_s1 = inlined_call_operand.vmem [shape: bf16[288,64], index: 1, kind: input, shape index: {}]   ;;  %s1606_s2 = inlined_call_operand.vmem [shape: f32[1,64], index: 2, kind: input, shape index: {}]   ;;  %s1607_s3 = inlined_call_operand.vmem [shape: f32[2,56,64], index: 3, kind: output, shape index: {}]  }
   0x1 LB: > { %s1020_s13 = sadd.s32 4294967295, %s1358_s12   ;;  %p1024_p0 = scmp.ge.s32.totalorder %s1358_s12, 1  ;;  %s1358_s12 = sphi %s1380_s12, %s13_s12  }
   0x2   : > { %p137_p1 = scmp.lt.s32.totalorder %s1358_s12, 3 }
   0x4   : > { %p138_p2 = pnand %p1024_p0, %p137_p1 }
   0x5   : > { %v1278_v0 = vld [vmem:[%s1605_s1 + $0x40] sm:$0xff] (!%p138_p2)   ;;  %v1280_v2 = vld [vmem:[%s1605_s1 + $0x48] sm:$0xff] (!%p138_p2)   ;;  %p161_p3 = scmp.lt.s32.totalorder (!%p138_p2), %s1020_s13, 1  ;;  %v1282_v4 = vld [vmem:[%s1605_s1 + $0x50] sm:$0xff] (!%p138_p2)   ;;  %vm582_vm0 = vcmask (!%p138_p2), 261120   ;;  %vm957_vm1 = vcmask (!%p138_p2), 523264  }
   0x6   : > { %141 = sbr.rel (%p138_p2) target bundleno = 346 (0x15a), region = 32  ;;  %v1279_v1 = vld [vmem:[%s1605_s1] sm:$0xff] (!%p138_p2)   ;;  %1104 = vmatprep.subr.bf16.mxu0 (!%p138_p2), %v1278_v0  ;;  %1252 = vmatprep.subr.bf16.mxu1 (!%p138_p2), %v1278_v0  ;;  %v1281_v3 = vld [vmem:[%s1605_s1 + $0x8] sm:$0xff] (!%p138_p2)   ;;  %v1283_v5 = vld [vmem:[%s1605_s1 + $0x10] sm:$0xff] (!%p138_p2)  }
   0x7   : > { %1105 = vmatpush3.bf16.msra.mxu0 (!%p138_p2), %v1279_v1  ;;  %1260 = vmatpush3.bf16.msra.mxu1 (!%p138_p2), %v1279_v1  ;;  %v1284_v6 = vld [vmem:[%s1605_s1 + $0x58] sm:$0xff] (!%p138_p2)   ;;  %v1286_v8 = vld [vmem:[%s1605_s1 + $0x60] sm:$0xff] (!%p138_p2)   ;;  %v1288_v10 = vld [vmem:[%s1605_s1 + $0x68] sm:$0xff] (!%p138_p2)  }
   0x8   : > { %1106 = vmatprep.subr.bf16.mxu0 (!%p138_p2), %v1280_v2  ;;  %1253 = vmatprep.subr.bf16.mxu1 (!%p138_p2), %v1280_v2  ;;  %v1285_v7 = vld [vmem:[%s1605_s1 + $0x18] sm:$0xff] (!%p138_p2)   ;;  %v1287_v9 = vld [vmem:[%s1605_s1 + $0x20] sm:$0xff] (!%p138_p2)   ;;  %v1289_v13 = vld [vmem:[%s1605_s1 + $0x28] sm:$0xff] (!%p138_p2)  }
   0x9   : > { %v1290_v14 = vld [vmem:[%s1605_s1 + $0x70] sm:$0xff] (!%p138_p2)   ;;  %v1292_v16 = vld [vmem:[%s1605_s1 + $0x78] sm:$0xff] (!%p138_p2)   ;;  %v1306_v18 = vld [vmem:[%s1605_s1 + $0x80] sm:$0xff] (!%p138_p2)  }
   0xa   : > { %v1291_v15 = vld [vmem:[%s1605_s1 + $0x30] sm:$0xff] (!%p138_p2)   ;;  %v1293_v17 = vld [vmem:[%s1605_s1 + $0x38] sm:$0xff] (!%p138_p2)   ;;  %v1313_v23 = vld [vmem:[%s1605_s1 + $0x88] sm:$0xff] (!%p138_p2)  }
   0xb   : > { %1107 = vmatpush3.bf16.msra.mxu0 (!%p138_p2), %v1281_v3  ;;  %1261 = vmatpush3.bf16.msra.mxu1 (!%p138_p2), %v1281_v3 }
   0xc   : > { %1108 = vmatprep.subr.bf16.mxu0 (!%p138_p2), %v1282_v4  ;;  %1254 = vmatprep.subr.bf16.mxu1 (!%p138_p2), %v1282_v4 }
   0xd   : > { %s1609_s13 = smov (!%p161_p3, %s1020_s13), 1 }
   0xe   : > { %s1268_s28 = smul.u32 336, %s1609_s13 }
   0xf   : > { %1109 = vmatpush3.bf16.msra.mxu0 %v1283_v5  ;;  %1262 = vmatpush3.bf16.msra.mxu1 %v1283_v5  ;;  %s1269_s29 = smul.u32 56, %s1609_s13 }
  0x10   : > { %1110 = vmatprep.subr.bf16.mxu0 %v1284_v6  ;;  %1255 = vmatprep.subr.bf16.mxu1 %v1284_v6  ;;  %s1421_s8 = scalar_lea.vmem %s1604_s0, %s1268_s28 }
  0x11   : > { %v1296_v11 = vld [vmem:[%s1421_s8 + $0x4] ss:$12 sps:$4 sm:$0xff]   ;;  %v1299_v12 = vld [vmem:[%s1421_s8 + $0x10c] ss:$12 sps:$4 sm:$0xff]   ;;  %v1297_v20 = vld [vmem:[%s1421_s8 + $0x108] ss:$12 sps:$4 sm:$0xff]   ;;  %s1565_s7 = scalar_lea.vmem %s1607_s3, %s1269_s29 }
  0x12   : > { %657 = vmatprep.mubr.bf16.mxu0 %v1296_v11  ;;  %745 = vmatprep.mubr.bf16.mxu1 %v1299_v12  ;;  %v1294_v19 = vld [vmem:[%s1421_s8] ss:$12 sps:$4 sm:$0xff]   ;;  %v1300_v21 = vld [vmem:[%s1421_s8 + $0x1c] ss:$12 sps:$4 sm:$0xff]   ;;  %v1302_v22 = vld [vmem:[%s1421_s8 + $0x124] ss:$12 sps:$4 sm:$0xff]  }
  0x13   : > { %1111 = vmatpush3.bf16.msra.mxu0 %v1285_v7  ;;  %1263 = vmatpush3.bf16.msra.mxu1 %v1285_v7  ;;  %v1304_v24 = vld [vmem:[%s1421_s8 + $0x18] ss:$12 sps:$4 sm:$0xff]   ;;  %v1305_v25 = vld [vmem:[%s1421_s8 + $0x120] ss:$12 sps:$4 sm:$0xff]   ;;  %v1309_v27 = vld [vmem:[%s1421_s8 + $0x13c] ss:$12 sps:$4 sm:$0xff]  }
  0x14   : > { %1112 = vmatprep.subr.bf16.mxu0 %v1286_v8  ;;  %1256 = vmatprep.subr.bf16.mxu1 %v1286_v8  ;;  %v1307_v26 = vld [vmem:[%s1421_s8 + $0x34] ss:$12 sps:$4 sm:$0xff]   ;;  %v1311_v28 = vld [vmem:[%s1421_s8 + $0x30] ss:$12 sps:$4 sm:$0xff]   ;;  %v1312_v29 = vld [vmem:[%s1421_s8 + $0x138] ss:$12 sps:$4 sm:$0xff]  }
  0x15   : > { %v1314_v30 = vld [vmem:[%s1421_s8 + $0x4c] ss:$12 sps:$4 sm:$0xff]   ;;  %v1316_v31 = vld [vmem:[%s1421_s8 + $0x8] ss:$12 sps:$4 sm:$0xff]   ;;  %v1319_v34 = vld [vmem:[%s1421_s8 + $0x64] ss:$12 sps:$4 sm:$0xff]  }
  0x16   : > { %v1317_v32 = vld [vmem:[%s1421_s8 + $0x48] ss:$12 sps:$4 sm:$0xff]   ;;  %v1318_v33 = vld [vmem:[%s1421_s8 + $0x20] ss:$12 sps:$4 sm:$0xff]   ;;  %v1321_v35 = vld [vmem:[%s1421_s8 + $0x38] ss:$12 sps:$4 sm:$0xff]  }
  0x17   : > { %1113 = vmatpush3.bf16.msra.mxu0 %v1287_v9  ;;  %1264 = vmatpush3.bf16.msra.mxu1 %v1287_v9  ;;  %v1322_v36 = vld [vmem:[%s1421_s8 + $0x60] ss:$12 sps:$4 sm:$0xff]   ;;  %v1323_v37 = vld [vmem:[%s1421_s8 + $0x50] ss:$12 sps:$4 sm:$0xff]   ;;  %v1326_v39 = vld [vmem:[%s1421_s8 + $0x68] ss:$12 sps:$4 sm:$0xff]  }
  0x18   : > { %1114 = vmatprep.subr.bf16.mxu0 %v1288_v10  ;;  %1257 = vmatprep.subr.bf16.mxu1 %v1288_v10  ;;  %v1324_v38 = vld [vmem:[%s1421_s8 + $0x7c] ss:$12 sps:$4 sm:$0xff]   ;;  %v1327_v40 = vld [vmem:[%s1421_s8 + $0x78] ss:$12 sps:$4 sm:$0xff]   ;;  %v1328_v41 = vld [vmem:[%s1421_s8 + $0x80] ss:$12 sps:$4 sm:$0xff]  }
  0x19   : > { %v1329_v42 = vld [vmem:[%s1421_s8 + $0x94] ss:$12 sps:$4 sm:$0xff]   ;;  %v1331_v43 = vld [vmem:[%s1421_s8 + $0x98] ss:$12 sps:$4 sm:$0xff]   ;;  %v1332_v44 = vld [vmem:[%s1421_s8 + $0x90] ss:$12 sps:$4 sm:$0xff]  }
  0x1a   : > { %v1333_v45 = vld [vmem:[%s1421_s8 + $0xb0] ss:$12 sps:$4 sm:$0xff]   ;;  %v1334_v46 = vld [vmem:[%s1421_s8 + $0xac] ss:$12 sps:$4 sm:$0xff]   ;;  %v1336_v47 = vld [vmem:[%s1421_s8 + $0xc8] ss:$12 sps:$4 sm:$0xff]  }
  0x1b   : > { %1115 = vmatpush3.bf16.msra.mxu0 %v1289_v13  ;;  %1265 = vmatpush3.bf16.msra.mxu1 %v1289_v13  ;;  %v1337_v48 = vld [vmem:[%s1421_s8 + $0xa8] ss:$12 sps:$4 sm:$0xff]   ;;  %v1338_v49 = vld [vmem:[%s1421_s8 + $0xe0] ss:$12 sps:$4 sm:$0xff]   ;;  %v1339_v50 = vld [vmem:[%s1421_s8 + $0xc4] ss:$12 sps:$4 sm:$0xff]  }
  0x1c   : > { %1116 = vmatprep.subr.bf16.mxu0 %v1290_v14  ;;  %1258 = vmatprep.subr.bf16.mxu1 %v1290_v14  ;;  %v1341_v51 = vld [vmem:[%s1421_s8 + $0xf8] ss:$12 sps:$4 sm:$0xff]   ;;  %v1342_v52 = vld [vmem:[%s1421_s8 + $0xc0] ss:$12 sps:$4 sm:$0xff]   ;;  %v1343_v53 = vld [vmem:[%s1421_s8 + $0x110] ss:$12 sps:$4 sm:$0xff]  }
  0x1d   : > { %v1344_v54 = vld [vmem:[%s1421_s8 + $0xdc] ss:$12 sps:$4 sm:$0xff]   ;;  %v1347_v56 = vld [vmem:[%s1421_s8 + $0xd8] ss:$12 sps:$4 sm:$0xff]   ;;  %v1348_v57 = vld [vmem:[%s1421_s8 + $0x140] ss:$12 sps:$4 sm:$0xff]  }
  0x1e   : > { %v1346_v55 = vld [vmem:[%s1421_s8 + $0x128] ss:$12 sps:$4 sm:$0xff]   ;;  %v1351_v59 = vld [vmem:[%s1421_s8 + $0xf0] ss:$12 sps:$4 sm:$0xff]  }
  0x1f   : > { %1117 = vmatpush3.bf16.msra.mxu0 %v1291_v15  ;;  %1266 = vmatpush3.bf16.msra.mxu1 %v1291_v15  ;;  %v1349_v58 = vld [vmem:[%s1421_s8 + $0xf4] ss:$12 sps:$4 sm:$0xff]  }
  0x20   : > { %1118 = vmatprep.subr.bf16.mxu0 %v1292_v16  ;;  %1259 = vmatprep.subr.bf16.mxu1 %v1292_v16 }
  0x23   : > { %1119 = vmatpush3.bf16.msra.mxu0 %v1293_v17  ;;  %1267 = vmatpush3.bf16.msra.mxu1 %v1293_v17 }
  0x24   : > { %1220 = vmatprep.subr.bf16.mxu1 %v1306_v18 }
  0x26   : > { %658 = vmatmul.mubr.bf16.vlgmr.msra.gmra.mrb[0].mxu0 %v1294_v19  ;;  %746 = vmatmul.mubr.bf16.vlgmr.msra.gmra.mrb[0].mxu1 %v1297_v20 }
  0x27   : > { %665 = vmatprep.mubr.bf16.mxu0 %v1300_v21  ;;  %753 = vmatprep.mubr.bf16.mxu1 %v1302_v22 }
  0x28   : > { %1221 = vmatpush3.bf16.msra.mxu1 %v1306_v18 }
  0x29   : > { %1222 = vmatprep.subr.bf16.mxu1 %v1313_v23 }
  0x2c   : > { %1223 = vmatpush3.bf16.msra.mxu1 %v1313_v23 }
  0x2e   : > { %666 = vmatmul.mubr.bf16.gmra.mrb[4].mxu0 %v1304_v24  ;;  %754 = vmatmul.mubr.bf16.gmra.mrb[4].mxu1 %v1305_v25 }
  0x2f   : > { %673 = vmatprep.mubr.bf16.mxu0 %v1307_v26  ;;  %761 = vmatprep.mubr.bf16.mxu1 %v1309_v27 }
  0x36   : > { %674 = vmatmul.mubr.bf16.gmra.mrb[8].mxu0 %v1311_v28  ;;  %762 = vmatmul.mubr.bf16.gmra.mrb[8].mxu1 %v1312_v29 }
  0x37   : > { %681 = vmatprep.mubr.bf16.mxu0 %v1314_v30  ;;  %1224 = vmatprep.mubr.msk.bf16.mxu1 %vm582_vm0, %v1316_v31 }
  0x3e   : > { %682 = vmatmul.mubr.bf16.gmra.mrb[12].mxu0 %v1317_v32  ;;  %1225 = vmatmul.mubr.msk.bf16.vlgmr.msra.gmra.mrb[12].mxu1 %vm582_vm0, %v1318_v33 }
  0x3f   : > { %689 = vmatprep.mubr.bf16.mxu0 %v1319_v34  ;;  %1228 = vmatprep.mubr.msk.bf16.mxu1 %vm582_vm0, %v1321_v35 }
  0x46   : > { %690 = vmatmul.mubr.bf16.gmra.mrb[16].mxu0 %v1322_v36  ;;  %1229 = vmatmul.mubr.msk.bf16.gmra.mrb[16].mxu1 %vm582_vm0, %v1323_v37 }
  0x47   : > { %697 = vmatprep.mubr.bf16.mxu0 %v1324_v38  ;;  %1232 = vmatprep.mubr.msk.bf16.mxu1 %vm582_vm0, %v1326_v39 }
  0x4e   : > { %698 = vmatmul.mubr.bf16.gmra.mrb[20].mxu0 %v1327_v40  ;;  %1233 = vmatmul.mubr.msk.bf16.gmra.mrb[20].mxu1 %vm582_vm0, %v1328_v41 }
  0x4f   : > { %705 = vmatprep.mubr.bf16.mxu0 %v1329_v42  ;;  %1236 = vmatprep.mubr.msk.bf16.mxu1 %vm582_vm0, %v1331_v43 }
  0x56   : > { %706 = vmatmul.mubr.bf16.gmra.mrb[24].mxu0 %v1332_v44  ;;  %1237 = vmatmul.mubr.msk.bf16.gmra.mrb[24].mxu1 %vm582_vm0, %v1333_v45 }
  0x57   : > { %713 = vmatprep.mubr.bf16.mxu0 %v1334_v46  ;;  %1240 = vmatprep.mubr.msk.bf16.mxu1 %vm582_vm0, %v1336_v47 }
  0x5e   : > { %714 = vmatmul.mubr.bf16.gmra.mrb[28].mxu0 %v1337_v48  ;;  %1241 = vmatmul.mubr.msk.bf16.gmra.mrb[28].mxu1 %vm582_vm0, %v1338_v49 }
  0x5f   : > { %721 = vmatprep.mubr.bf16.mxu0 %v1339_v50  ;;  %1244 = vmatprep.mubr.msk.bf16.mxu1 %vm582_vm0, %v1341_v51 }
  0x66   : > { %722 = vmatmul.mubr.bf16.gmra.mrb[32].mxu0 %v1342_v52  ;;  %1245 = vmatmul.mubr.msk.bf16.gmra.mrb[32].mxu1 %vm582_vm0, %v1343_v53 }
  0x67   : > { %729 = vmatprep.mubr.bf16.mxu0 %v1344_v54  ;;  %1248 = vmatprep.mubr.msk.bf16.mxu1 %vm582_vm0, %v1346_v55 }
  0x6e   : > { %730 = vmatmul.mubr.bf16.gmra.mrb[36].mxu0 %v1347_v56  ;;  %1249 = vmatmul.mubr.msk.bf16.gmra.mrb[36].mxu1 %vm582_vm0, %v1348_v57 }
  0x6f   : > { %737 = vmatprep.mubr.bf16.mxu0 %v1349_v58 }
  0x76   : > { %738 = vmatmul.mubr.bf16.gmra.mrb[40].mxu0 %v1351_v59 }
  0xf9   : > { %v1120_v60 = vpop.f32.mrb[0].mxu0  ;;  %v1186_v61 = vpop.f32.mrb[0].mxu1 }
  0xfa   : > { %v1121_v62 = vpop.f32.mrb[1].mxu0  ;;  %v1187_v63 = vpop.f32.mrb[1].mxu1 }
  0xfb   : > { %v1122_v0 = vadd.f32 %v1121_v62, %v1120_v60  ;;  %v1123_v1 = vpop.f32.mrb[2].mxu0  ;;  %v1506_v2 = vadd.f32 %v1187_v63, %v1186_v61  ;;  %v1189_v3 = vpop.f32.mrb[2].mxu1 }
  0xfc   : > { %v1124_v4 = vpop.f32.mrb[3].mxu0  ;;  %v1190_v5 = vpop.f32.mrb[3].mxu1 }
  0xfd   : > { %v1125_v6 = vadd.f32 %v1124_v4, %v1123_v1  ;;  %v1508_v7 = vadd.f32 %v1190_v5, %v1189_v3 }
 0x101   : > { %v1126_v8 = vpop.f32.mrb[4].mxu0  ;;  %v1192_v9 = vpop.f32.mrb[4].mxu1 }
 0x102   : > { %v1127_v10 = vpop.f32.mrb[5].mxu0  ;;  %v1193_v11 = vpop.f32.mrb[5].mxu1 }
 0x103   : > { %v1128_v12 = vadd.f32 %v1127_v10, %v1126_v8  ;;  %v1129_v13 = vpop.f32.mrb[6].mxu0  ;;  %v1510_v14 = vadd.f32 %v1193_v11, %v1192_v9  ;;  %v1195_v15 = vpop.f32.mrb[6].mxu1 }
 0x104   : > { %v1130_v16 = vpop.f32.mrb[7].mxu0  ;;  %v1196_v17 = vpop.f32.mrb[7].mxu1 }
 0x105   : > { %v1131_v18 = vadd.f32 %v1130_v16, %v1129_v13  ;;  %v1512_v19 = vadd.f32 %v1196_v17, %v1195_v15 }
 0x109   : > { %v1132_v20 = vpop.f32.mrb[8].mxu0  ;;  %v1198_v21 = vpop.f32.mrb[8].mxu1 }
 0x10a   : > { %v1133_v22 = vpop.f32.mrb[9].mxu0  ;;  %v1199_v23 = vpop.f32.mrb[9].mxu1 }
 0x10b   : > { %v1134_v24 = vadd.f32 %v1133_v22, %v1132_v20  ;;  %v1135_v25 = vpop.f32.mrb[10].mxu0  ;;  %v1514_v26 = vadd.f32 %v1199_v23, %v1198_v21  ;;  %v1201_v27 = vpop.f32.mrb[10].mxu1 }
 0x10c   : > { %v1136_v28 = vpop.f32.mrb[11].mxu0  ;;  %v1202_v29 = vpop.f32.mrb[11].mxu1 }
 0x10d   : > { %v1137_v30 = vadd.f32 %v1136_v28, %v1135_v25  ;;  %v1516_v31 = vadd.f32 %v1202_v29, %v1201_v27 }
 0x111   : > { %v1138_v32 = vpop.f32.mrb[12].mxu0  ;;  %v1226_v33 = vpop.f32.mrb[12].mxu1 }
 0x112   : > { %v1518_v34 = vadd.f32 %v1226_v33, %v1128_v12  ;;  %v1139_v35 = vpop.f32.mrb[13].mxu0  ;;  %v804_v36 = vpop.f32.mrb[13].mxu1 }
 0x113   : > { %v1140_v37 = vadd.f32 %v1139_v35, %v1138_v32  ;;  %v1520_v38 = vadd.f32 %v1122_v0, %v804_v36  ;;  %v1141_v39 = vpop.f32.mrb[14].mxu0  ;;  %v1227_v40 = vpop.f32.mrb[14].mxu1 }
 0x114   : > { %v1522_v41 = vadd.f32 %v1227_v40, %v1131_v18  ;;  %v1142_v42 = vpop.f32.mrb[15].mxu0  ;;  %v807_v43 = vpop.f32.mrb[15].mxu1 }
 0x115   : > { %v1143_v44 = vadd.f32 %v1142_v42, %v1141_v39  ;;  %v1524_v45 = vadd.f32 %v1125_v6, %v807_v43 }
 0x119   : > { %v1144_v46 = vpop.f32.mrb[16].mxu0  ;;  %v1230_v47 = vpop.f32.mrb[16].mxu1 }
 0x11a   : > { %v1526_v48 = vadd.f32 %v1230_v47, %v1140_v37  ;;  %v1145_v49 = vpop.f32.mrb[17].mxu0  ;;  %v820_v50 = vpop.f32.mrb[17].mxu1 }
 0x11b   : > { %v1146_v51 = vadd.f32 %v1145_v49, %v1144_v46  ;;  %v1528_v52 = vadd.f32 %v1134_v24, %v820_v50  ;;  %v1147_v53 = vpop.f32.mrb[18].mxu0  ;;  %v1231_v54 = vpop.f32.mrb[18].mxu1 }
 0x11c   : > { %v1530_v55 = vadd.f32 %v1231_v54, %v1143_v44  ;;  %v1148_v56 = vpop.f32.mrb[19].mxu0  ;;  %v823_v57 = vpop.f32.mrb[19].mxu1 }
 0x11d   : > { %v1149_v58 = vadd.f32 %v1148_v56, %v1147_v53  ;;  %v1532_v59 = vadd.f32 %v1137_v30, %v823_v57 }
 0x11e   : > { %v915_v60 = vmax.f32 %v1520_v38, %v1530_v55 }
 0x121   : > { %v1150_v61 = vpop.f32.mrb[20].mxu0  ;;  %v1234_v62 = vpop.f32.mrb[20].mxu1 }
 0x122   : > { %v1151_v63 = vpop.f32.mrb[21].mxu0  ;;  %v836_v0 = vpop.f32.mrb[21].mxu1 }
 0x123   : > { %v1152_v1 = vadd.f32 %v1151_v63, %v1150_v61  ;;  %v837_v3 = vadd.f32 %v1146_v51, %v836_v0  ;;  %v1153_v4 = vpop.f32.mrb[22].mxu0  ;;  %v1235_v5 = vpop.f32.mrb[22].mxu1 }
 0x124   : > { %v1154_v6 = vpop.f32.mrb[23].mxu0  ;;  %v839_v8 = vpop.f32.mrb[23].mxu1 }
 0x125   : > { %v1536_v9 = vadd.f32 %v1234_v62, %v1152_v1  ;;  %v916_v10 = vmax.f32 %v1524_v45, %v837_v3  ;;  %v1155_v11 = vadd.f32 %v1154_v6, %v1153_v4  ;;  %v840_v12 = vadd.f32 %v1149_v58, %v839_v8  ;;  %v1101_v3 = vld [vmem:[%s1606_s2] ss:$0 sm:$0xff] }
 0x127   : > { %v918_v13 = vmax.f32 %v1522_v41, %v1536_v9  ;;  %v1541_v15 = vadd.f32 %v1235_v5, %v1155_v11  ;;  %v917_v16 = vmax.f32 %v1518_v34, %v840_v12 }
 0x129   : > { %v919_v17 = vmax.f32 %v1528_v52, %v1541_v15  ;;  %v1156_v18 = vpop.f32.mrb[24].mxu0  ;;  %v1238_v20 = vpop.f32.mrb[24].mxu1 }
 0x12a   : > { %v1157_v21 = vpop.f32.mrb[25].mxu0  ;;  %v852_v22 = vpop.f32.mrb[25].mxu1 }
 0x12b   : > { %v1158_v23 = vadd.f32 %v1157_v21, %v1156_v18  ;;  %v1159_v24 = vpop.f32.mrb[26].mxu0  ;;  %v1239_v25 = vpop.f32.mrb[26].mxu1 }
 0x12c   : > { %v1160_v27 = vpop.f32.mrb[27].mxu0  ;;  %v855_v28 = vpop.f32.mrb[27].mxu1 }
 0x12d   : > { %v1161_v29 = vadd.f32 %v1160_v27, %v1159_v24  ;;  %v1546_v30 = vadd.f32 %v1158_v23, %v852_v22 }
 0x12f   : > { %v920_v32 = vmax.f32 %v1532_v59, %v1546_v30  ;;  %v1550_v33 = vadd.f32 %v1161_v29, %v855_v28 }
 0x131   : > { %v921_v34 = vmax.f32 %v1526_v48, %v1550_v33  ;;  %v1162_v35 = vpop.f32.mrb[28].mxu0  ;;  %v1242_v36 = vpop.f32.mrb[28].mxu1 }
 0x132   : > { %v1163_v37 = vpop.f32.mrb[29].mxu0  ;;  %v868_v39 = vpop.f32.mrb[29].mxu1 }
 0x133   : > { %v1164_v40 = vadd.f32 %v1163_v37, %v1162_v35  ;;  %v1165_v42 = vpop.f32.mrb[30].mxu0  ;;  %v1243_v43 = vpop.f32.mrb[30].mxu1 }
 0x134   : > { %v1166_v44 = vpop.f32.mrb[31].mxu0  ;;  %v871_v45 = vpop.f32.mrb[31].mxu1 }
 0x135   : > { %v1554_v46 = vadd.f32 %v1238_v20, %v1164_v40  ;;  %v1167_v47 = vadd.f32 %v1166_v44, %v1165_v42 }
 0x137   : > { %v864_v49 = vadd.f32 %v1239_v25, %v1167_v47 }
 0x139   : > { %v1168_v50 = vpop.f32.mrb[32].mxu0  ;;  %v1246_v51 = vpop.f32.mrb[32].mxu1 }
 0x13a   : > { %v893_v53 = vadd.f32 %v1246_v51, %v1506_v2  ;;  %v1169_v54 = vpop.f32.mrb[33].mxu0  ;;  %v884_v56 = vpop.f32.mrb[33].mxu1 }
 0x13b   : > { %v1170_v57 = vadd.f32 %v1169_v54, %v1168_v50  ;;  %v1171_v58 = vpop.f32.mrb[34].mxu0  ;;  %v1247_v61 = vpop.f32.mrb[34].mxu1 }
 0x13c   : > { %v923_v62 = vmax.f32 %v864_v49, %v893_v53  ;;  %v896_v63 = vadd.f32 %v1247_v61, %v1508_v7  ;;  %v1172_v0 = vpop.f32.mrb[35].mxu0  ;;  %v887_v1 = vpop.f32.mrb[35].mxu1 }
 0x13d   : > { %v869_v4 = vadd.f32 %v1170_v57, %v868_v39  ;;  %v1173_v5 = vadd.f32 %v1172_v0, %v1171_v58 }
 0x13e   : > { %v930_v6 = vmax.f32 %v916_v10, %v923_v62 }
 0x13f   : > { %v924_v8 = vmax.f32 %v869_v4, %v896_v63  ;;  %v872_v2 = vadd.f32 %v1173_v5, %v871_v45 }
 0x140   : > { %v944_v11 = vadd.f32 %v1101_v3, %v930_v6 }
 0x141   : > { %v931_v7 = vmax.f32 %v917_v16, %v924_v8  ;;  %v1174_v12 = vpop.f32.mrb[36].mxu0  ;;  %v1250_v18 = vpop.f32.mrb[36].mxu1 }
 0x142   : > { %v951_v20 = vmax.f32 %v944_v11, 0.0  ;;  %v909_v21 = vadd.f32 %v1250_v18, %v1514_v26  ;;  %v1175_v22 = vpop.f32.mrb[37].mxu0  ;;  %v900_v23 = vpop.f32.mrb[37].mxu1 }
 0x143   : > { %v945_v10 = vadd.f32 %v1101_v3, %v931_v7  ;;  %v1176_v24 = vadd.f32 %v1175_v22, %v1174_v12  ;;  %v901_v25 = vadd.f32 %v1510_v14, %v900_v23  ;;  %v1177_v27 = vpop.f32.mrb[38].mxu0  ;;  %v1251_v28 = vpop.f32.mrb[38].mxu1 }
 0x144   : > { %959 = vst.msk [vmem:[%s1565_s7 + $0x8] sm:$0xff] %vm957_vm1, %v951_v20  ;;  %v912_v29 = vadd.f32 %v1251_v28, %v1516_v31  ;;  %v1178_v35 = vpop.f32.mrb[39].mxu0  ;;  %v903_v16 = vpop.f32.mrb[39].mxu1 }
 0x145   : > { %v952_v37 = vmax.f32 %v945_v10, 0.0  ;;  %v877_v39 = vadd.f32 %v1242_v36, %v1176_v24  ;;  %v925_v40 = vmax.f32 %v872_v2, %v901_v25  ;;  %v1179_v42 = vadd.f32 %v1178_v35, %v1177_v27 }
 0x146   : > { %v904_v26 = vadd.f32 %v1512_v19, %v903_v16 }
 0x147   : > { %960 = vst.msk [vmem:[%s1565_s7 + $0x10] sm:$0xff] %vm957_vm1, %v952_v37  ;;  %v932_v14 = vmax.f32 %v918_v13, %v925_v40  ;;  %v880_v44 = vadd.f32 %v1243_v43, %v1179_v42 }
 0x148   : > { %v926_v45 = vmax.f32 %v877_v39, %v904_v26 }
 0x149   : > { %v946_v47 = vadd.f32 %v1101_v3, %v932_v14  ;;  %v927_v49 = vmax.f32 %v880_v44, %v909_v21  ;;  %v1180_v31 = vpop.f32.mrb[40].mxu0 }
 0x14a   : > { %v933_v36 = vmax.f32 %v919_v17, %v926_v45  ;;  %v1181_v50 = vpop.f32.mrb[41].mxu0 }
 0x14b   : > { %v953_v19 = vmax.f32 %v946_v47, 0.0  ;;  %v934_v51 = vmax.f32 %v920_v32, %v927_v49  ;;  %v1182_v53 = vadd.f32 %v1181_v50, %v1180_v31  ;;  %v1183_v41 = vpop.f32.mrb[42].mxu0 }
 0x14c   : > { %v947_v9 = vadd.f32 %v1101_v3, %v933_v36  ;;  %v1184_v13 = vpop.f32.mrb[43].mxu0 }
 0x14d   : > { %961 = vst.msk [vmem:[%s1565_s7 + $0x18] sm:$0xff] %vm957_vm1, %v953_v19  ;;  %v948_v43 = vadd.f32 %v1101_v3, %v934_v51  ;;  %v885_v54 = vadd.f32 %v1182_v53, %v884_v56  ;;  %v1185_v52 = vadd.f32 %v1184_v13, %v1183_v41 }
 0x14e   : > { %v954_v15 = vmax.f32 %v947_v9, 0.0 }
 0x14f   : > { %v955_v17 = vmax.f32 %v948_v43, 0.0  ;;  %v928_v57 = vmax.f32 %v885_v54, %v912_v29  ;;  %v888_v58 = vadd.f32 %v1185_v52, %v887_v1 }
 0x150   : > { %962 = vst.msk [vmem:[%s1565_s7 + $0x20] sm:$0xff] %vm957_vm1, %v954_v15 }
 0x151   : > { %963 = vst.msk [vmem:[%s1565_s7 + $0x28] sm:$0xff] %vm957_vm1, %v955_v17  ;;  %v935_v59 = vmax.f32 %v921_v34, %v928_v57  ;;  %v922_v30 = vmax.f32 %v1554_v46, %v888_v58 }
 0x153   : > { %v949_v32 = vadd.f32 %v1101_v3, %v935_v59  ;;  %v929_v56 = vmax.f32 %v915_v60, %v922_v30 }
 0x155   : > { %v956_v61 = vmax.f32 %v949_v32, 0.0  ;;  %v943_v62 = vadd.f32 %v1101_v3, %v929_v56 }
 0x157   : > { %964 = vst.msk [vmem:[%s1565_s7 + $0x30] sm:$0xff] %vm957_vm1, %v956_v61  ;;  %v950_v63 = vmax.f32 %v943_v62, 0.0 }
 0x159   : > { %958 = vst.msk [vmem:[%s1565_s7] sm:$0xff] %vm957_vm1, %v950_v63 }
 0x15a PF: > { %s13_s12 = sadd.s32 1, %s1358_s12  }
 0x15b   : > { %p10_p4 = scmp.ge.s32.totalorder %s13_s12, 4  }
 0x15d   :  { %12 = sbr.rel (!%p10_p4) target bundleno = 1 (0x1), region = 62 }

// kernel: _lambda_.5
= control target key start
LH: loop header
LB: loop body
LE: loop exit
PB: predicated region body
PF: predicated region fallthrough
CT: control target
= control target key end

     0   :  { %10 = vsyncpa [#allocation3], 0  ;;  %s3372_s0 = inlined_call_operand.vmem [shape: bf16[2,4,16,576], index: 0, kind: input, shape index: {}]   ;;  %s3373_s1 = inlined_call_operand.vmem [shape: bf16[576,128], index: 1, kind: input, shape index: {}]   ;;  %s3374_s2 = inlined_call_operand.vmem [shape: f32[1,128], index: 2, kind: input, shape index: {}]   ;;  %s3375_s3 = inlined_call_operand.vmem [shape: bf16[9,128,10], index: 3, kind: input, shape index: {}]   ;;  %s3376_s4 = inlined_call_operand.vmem [shape: f32[1,10], index: 4, kind: input, shape index: {}]   ;;  %s3377_s5 = inlined_call_operand.hbm [shape: f32[2,1,10], index: 5, kind: output, shape index: {}]  }
   0x1   :  { %12 = vsyncpa [#allocation3 + $0x1], 0  ;;  %s2812_s18 = smov 0   ;;  %s2814_s19 = smov 0  }
   0x2   :  { %s2816_s20 = smov 0   ;;  %s2818_s21 = smov 0  }
   0x3 LB: > { %s2833_s22 = sadd.s32 4294967295, %s2777_s21   ;;  %s1903_s23 = sadd.s32 4294967294, %s2777_s21   ;;  %s2777_s21 = sphi %s2818_s21, %s3383_s21   ;;  %s2773_s20 = sphi %s2816_s20, %s3382_s20   ;;  %s2769_s19 = sphi %s2814_s19, %s3381_s19   ;;  %s2765_s18 = sphi %s2812_s18, %s3380_s18  }
   0x4   : > { %s2837_s24 = sadd.s32 1, %s2777_s21   ;;  %s135_s25 = sadd.s32 1, %s2773_s20 }
   0x5   : > { %s132_s26 = ssub.s32 %s2777_s21, %s2837_s24  ;;  %p145_p0 = scmp.ne.s32.totalorder %s2773_s20, %s2769_s19 }
   0x6   : > { %p133_p1 = scmp.eq.s32.totalorder %s132_s26, 0  ;;  %p146_p2 = scmp.eq.s32.totalorder %s2833_s22, 1 }
   0x7   : > { %p151_p3 = scmp.ne.s32.totalorder %s2769_s19, %s2765_s18  ;;  %p152_p4 = scmp.eq.s32.totalorder %s1903_s23, 1 }
   0x8   : > { %s2848_s27 = scalar_select %p133_p1, %s2773_s20, %s135_s25  }
   0x9   : > { %p2850_p5 = por %p146_p2, %p145_p0  ;;  %p2854_p6 = por %p152_p4, %p151_p3 }
   0xa   : > { %p1906_p7 = scmp.ge.s32.totalorder %s2777_s21, 1  ;;  %p190_p8 = scmp.lt.s32.totalorder %s2777_s21, 3 }
   0xc   : > { %p191_p9 = pnand %p1906_p7, %p190_p8 }
   0xd   : > { %v2579_v0 = vld [vmem:[%s3373_s1 + $0x40] sm:$0xff] (!%p191_p9)   ;;  %v2583_v4 = vld [vmem:[%s3373_s1 + $0x48] sm:$0xff] (!%p191_p9)   ;;  %v2587_v8 = vld [vmem:[%s3373_s1 + $0x50] sm:$0xff] (!%p191_p9)   ;;  %p217_p10 = scmp.lt.s32.totalorder (!%p191_p9), %s2833_s22, 1  ;;  %vm635_vm0 = vcmask (!%p191_p9), 523264   ;;  %v2779_v56 = vmov (!%p191_p9), 0.0  }
   0xe   : > { %194 = sbr.rel (%p191_p9) target bundleno = 674 (0x2a2), region = 40  ;;  %v2580_v1 = vld [vmem:[%s3373_s1 + $0xc0] sm:$0xff] (!%p191_p9)   ;;  %2172 = vmatprep.subr.bf16.mxu0 (!%p191_p9), %v2579_v0  ;;  %v2584_v5 = vld [vmem:[%s3373_s1 + $0xc8] sm:$0xff] (!%p191_p9)   ;;  %v2588_v9 = vld [vmem:[%s3373_s1 + $0xd0] sm:$0xff] (!%p191_p9)   ;;  %vm2780_vm1 = vmmov (!%p191_p9), 0   ;;  %s215_s26 = sand.u32 (!%p191_p9), 1, %s2769_s19  }
   0xf   : > { %v2581_v2 = vld [vmem:[%s3373_s1] sm:$0xff] (!%p191_p9)   ;;  %2212 = vmatprep.subr.bf16.mxu1 (!%p191_p9), %v2580_v1  ;;  %v2585_v6 = vld [vmem:[%s3373_s1 + $0x8] sm:$0xff] (!%p191_p9)   ;;  %v2589_v10 = vld [vmem:[%s3373_s1 + $0x10] sm:$0xff] (!%p191_p9)   ;;  %s2169_s7 = sshll.u32 (!%p191_p9), %s2833_s22, 4  ;;  %s216_s8 = scalar_lea.vmem (!%p191_p9), [#allocation2], %s215_s26  ;;  %vm1833_vm2 = vcmask (!%p191_p9), 73728  }
  0x10   : > { %v2582_v3 = vld [vmem:[%s3373_s1 + $0x80] sm:$0xff] (!%p191_p9)   ;;  %2173 = vmatpush3.bf16.msra.mxu0 (!%p191_p9), %v2581_v2  ;;  %v2586_v7 = vld [vmem:[%s3373_s1 + $0x88] sm:$0xff] (!%p191_p9)   ;;  %v2590_v11 = vld [vmem:[%s3373_s1 + $0x90] sm:$0xff] (!%p191_p9)   ;;  %s1848_s9 = sshll.u32 (!%p191_p9), %s216_s8, 4  ;;  %s3330_s12 = scalar_lea.hbm (!%p191_p9), %s3377_s5, %s2169_s7  ;;  %s3332_s9 = int_to_ptr.vmem [resolvable:$true] %s1848_s9 }
  0x11   : > { %2213 = vmatpush3.bf16.msra.mxu1 (!%p191_p9), %v2582_v3  ;;  %2174 = vmatprep.subr.bf16.mxu0 (!%p191_p9), %v2583_v4  ;;  %v2591_v12 = vld [vmem:[%s3373_s1 + $0x58] sm:$0xff] (!%p191_p9)   ;;  %v2595_v16 = vld [vmem:[%s3373_s1 + $0x60] sm:$0xff] (!%p191_p9)   ;;  %v2599_v20 = vld [vmem:[%s3373_s1 + $0x68] sm:$0xff] (!%p191_p9)   ;;  %s2715_s13 = scalar_lea.vmem (!%p191_p9), %s3332_s9, 16  ;;  %s2781_s14 = smov (!%p191_p9), [#allocation2]  }
  0x12   : > { %2214 = vmatprep.subr.bf16.mxu1 (!%p191_p9), %v2584_v5  ;;  %v2592_v13 = vld [vmem:[%s3373_s1 + $0xd8] sm:$0xff] (!%p191_p9)   ;;  %v2596_v17 = vld [vmem:[%s3373_s1 + $0xe0] sm:$0xff] (!%p191_p9)   ;;  %v2600_v21 = vld [vmem:[%s3373_s1 + $0xe8] sm:$0xff] (!%p191_p9)   ;;  %p2716_p11 = scmp.ne.s32.totalorder (!%p191_p9), %s3332_s9, %s2715_s13  ;;  %s2719_s15 = sshll.u32 (!%p191_p9), %s2781_s14, 4  ;;  %s2720_s15 = int_to_ptr.vmem [resolvable:$false] %s2719_s15 }
  0x13   : > { %v2593_v14 = vld [vmem:[%s3373_s1 + $0x18] sm:$0xff] (!%p191_p9)   ;;  %v2597_v18 = vld [vmem:[%s3373_s1 + $0x20] sm:$0xff] (!%p191_p9)   ;;  %v2601_v22 = vld [vmem:[%s3373_s1 + $0x28] sm:$0xff] (!%p191_p9)   ;;  %s2721_s16 = scalar_lea.vmem (!%p191_p9), %s2720_s15, 32  ;;  %p2722_p0 = scmp.lt.s32.totalorder (!%p191_p9), %s3332_s9, %s2720_s15 }
  0x14   : > { %2175 = vmatpush3.bf16.msra.mxu0 (!%p191_p9), %v2585_v6  ;;  %v2594_v15 = vld [vmem:[%s3373_s1 + $0x98] sm:$0xff] (!%p191_p9)   ;;  %v2598_v19 = vld [vmem:[%s3373_s1 + $0xa0] sm:$0xff] (!%p191_p9)   ;;  %v2602_v23 = vld [vmem:[%s3373_s1 + $0xa8] sm:$0xff] (!%p191_p9)   ;;  %p2717_p12 = pnand (!%p191_p9), %p2716_p11, %p2850_p5  ;;  %p2723_p1 = scmp.lt.s32.totalorder (!%p191_p9), %s2721_s16, %s2715_s13 }
  0x15   : > { %2215 = vmatpush3.bf16.msra.mxu1 %v2586_v7  ;;  %2176 = vmatprep.subr.bf16.mxu0 %v2587_v8  ;;  %s218_s17 = scalar_select %p217_p10, %s2833_s22, 1  ;;  %v2603_v24 = vld [vmem:[%s3373_s1 + $0x70] sm:$0xff]   ;;  %v2607_v28 = vld [vmem:[%s3373_s1 + $0x78] sm:$0xff]   ;;  %v2617_v36 = vld [vmem:[%s3373_s1 + $0x100] sm:$0xff]  }
  0x16   : > { %2216 = vmatprep.subr.bf16.mxu1 %v2588_v9  ;;  %v2604_v25 = vld [vmem:[%s3373_s1 + $0xf0] sm:$0xff]   ;;  %v2608_v29 = vld [vmem:[%s3373_s1 + $0xf8] sm:$0xff]   ;;  %v2624_v39 = vld [vmem:[%s3373_s1 + $0x108] sm:$0xff]   ;;  %s1836_s22 = scalar_lea.sflag [#allocation3], %s215_s26  ;;  %p2718_p13 = pneg %p2717_p12 }
  0x17   : > { %s2537_s10 = smul.u32 160, %s218_s17  ;;  %v2605_v26 = vld [vmem:[%s3373_s1 + $0x30] sm:$0xff]   ;;  %v2609_v30 = vld [vmem:[%s3373_s1 + $0x38] sm:$0xff]   ;;  %v2643_v57 = vld [vmem:[%s3375_s3] sm:$0xff]   ;;  %p2724_p2 = por %p2723_p1, %p2722_p0 }
  0x18   : > { %2177 = vmatpush3.bf16.msra.mxu0 %v2589_v10  ;;  %v2606_v27 = vld [vmem:[%s3373_s1 + $0xb0] sm:$0xff]   ;;  %v2610_v31 = vld [vmem:[%s3373_s1 + $0xb8] sm:$0xff]   ;;  %v2644_v58 = vld [vmem:[%s3375_s3 + $0x40] sm:$0xff]  }
  0x19   : > { %2217 = vmatpush3.bf16.msra.mxu1 %v2590_v11  ;;  %2178 = vmatprep.subr.bf16.mxu0 %v2591_v12  ;;  %s2955_s30 = scalar_lea.vmem %s3372_s0, %s2537_s10  ;;  %v2631_v44 = vld [vmem:[%s3373_s1 + $0x110] sm:$0xff]   ;;  %v2638_v45 = vld [vmem:[%s3373_s1 + $0x118] sm:$0xff]   ;;  %v2645_v59 = vld [vmem:[%s3375_s3 + $0x8] sm:$0xff]   ;;  %p2725_p3 = pnand %p2724_p2, %p2718_p13 }
  0x1a   : > { %2218 = vmatprep.subr.bf16.mxu1 %v2592_v13  ;;  %v2611_v32 = vld [vmem:[%s2955_s30] ss:$20 sps:$4 sm:$0xff]   ;;  %v2613_v33 = vld [vmem:[%s2955_s30 + $0x4] ss:$20 sps:$4 sm:$0xff]   ;;  %v2614_v34 = vld [vmem:[%s2955_s30 + $0x8] ss:$20 sps:$4 sm:$0xff]  }
  0x1b   : > { %v2616_v35 = vld [vmem:[%s2955_s30 + $0xc] ss:$20 sps:$4 sm:$0xff]   ;;  %680 = vmatprep.mubr.bf16.mxu0 %v2613_v33  ;;  %v2620_v38 = vld [vmem:[%s2955_s30 + $0x34] ss:$20 sps:$4 sm:$0xff]   ;;  %v2623_v41 = vld [vmem:[%s2955_s30 + $0x30] ss:$20 sps:$4 sm:$0xff]  }
  0x1c   : > { %2179 = vmatpush3.bf16.msra.mxu0 %v2593_v14  ;;  %745 = vmatprep.mubr.bf16.mxu1 %v2616_v35  ;;  %v2618_v37 = vld [vmem:[%s2955_s30 + $0x2c] ss:$20 sps:$4 sm:$0xff]   ;;  %v2622_v40 = vld [vmem:[%s2955_s30 + $0x28] ss:$20 sps:$4 sm:$0xff]   ;;  %v2629_v46 = vld [vmem:[%s2955_s30 + $0x50] ss:$20 sps:$4 sm:$0xff]  }
  0x1d   : > { %2219 = vmatpush3.bf16.msra.mxu1 %v2594_v15  ;;  %2180 = vmatprep.subr.bf16.mxu0 %v2595_v16  ;;  %v2625_v42 = vld [vmem:[%s2955_s30 + $0x54] ss:$20 sps:$4 sm:$0xff]   ;;  %v2627_v43 = vld [vmem:[%s2955_s30 + $0x5c] ss:$20 sps:$4 sm:$0xff]   ;;  %v2630_v47 = vld [vmem:[%s2955_s30 + $0x58] ss:$20 sps:$4 sm:$0xff]  }
  0x1e   : > { %2220 = vmatprep.subr.bf16.mxu1 %v2596_v17  ;;  %v2632_v48 = vld [vmem:[%s2955_s30 + $0x7c] ss:$20 sps:$4 sm:$0xff]   ;;  %v2634_v49 = vld [vmem:[%s2955_s30 + $0x84] ss:$20 sps:$4 sm:$0xff]   ;;  %v2637_v51 = vld [vmem:[%s2955_s30 + $0x80] ss:$20 sps:$4 sm:$0xff]  }
  0x1f   : > { %v2636_v50 = vld [vmem:[%s2955_s30 + $0x78] ss:$20 sps:$4 sm:$0xff]   ;;  %v2639_v52 = vld [vmem:[%s2955_s30 + $0x10] ss:$20 sps:$4 sm:$0xff]   ;;  %v2641_v54 = vld [vmem:[%s2955_s30 + $0x60] ss:$20 sps:$4 sm:$0xff]  }
  0x20   : > { %2181 = vmatpush3.bf16.msra.mxu0 %v2597_v18  ;;  %v2640_v53 = vld [vmem:[%s2955_s30 + $0x38] ss:$20 sps:$4 sm:$0xff]   ;;  %v2642_v55 = vld [vmem:[%s2955_s30 + $0x88] ss:$20 sps:$4 sm:$0xff]   ;;  %v2647_v61 = vld [vmem:[%s3375_s3 + $0x10] sm:$0xff]  }
  0x21   : > { %2221 = vmatpush3.bf16.msra.mxu1 %v2598_v19  ;;  %2182 = vmatprep.subr.bf16.mxu0 %v2599_v20  ;;  %v2646_v60 = vld [vmem:[%s3375_s3 + $0x48] sm:$0xff]   ;;  %v2648_v62 = vld [vmem:[%s3375_s3 + $0x50] sm:$0xff]   ;;  %v2649_v63 = vld [vmem:[%s3375_s3 + $0x18] sm:$0xff]  }
  0x22   : > { %2222 = vmatprep.subr.bf16.mxu1 %v2600_v21  ;;  %v2650_v0 = vld [vmem:[%s3375_s3 + $0x58] sm:$0xff]   ;;  %v2651_v1 = vld [vmem:[%s3375_s3 + $0x20] sm:$0xff]   ;;  %v2653_v3 = vld [vmem:[%s3375_s3 + $0x28] sm:$0xff]  }
  0x23   : > { %v2652_v2 = vld [vmem:[%s3375_s3 + $0x60] sm:$0xff]   ;;  %v2654_v4 = vld [vmem:[%s3375_s3 + $0x68] sm:$0xff]   ;;  %v2655_v5 = vld [vmem:[%s3375_s3 + $0x30] sm:$0xff]  }
  0x24   : > { %2183 = vmatpush3.bf16.msra.mxu0 %v2601_v22  ;;  %v2656_v6 = vld [vmem:[%s3375_s3 + $0x70] sm:$0xff]   ;;  %v2657_v7 = vld [vmem:[%s3375_s3 + $0x38] sm:$0xff]  }
  0x25   : > { %2223 = vmatpush3.bf16.msra.mxu1 %v2602_v23  ;;  %2184 = vmatprep.subr.bf16.mxu0 %v2603_v24  ;;  %v2658_v8 = vld [vmem:[%s3375_s3 + $0x78] sm:$0xff]  }
  0x26   : > { %2224 = vmatprep.subr.bf16.mxu1 %v2604_v25 }
  0x28   : > { %2185 = vmatpush3.bf16.msra.mxu0 %v2605_v26 }
  0x29   : > { %2225 = vmatpush3.bf16.msra.mxu1 %v2606_v27  ;;  %2186 = vmatprep.subr.bf16.mxu0 %v2607_v28 }
  0x2a   : > { %2226 = vmatprep.subr.bf16.mxu1 %v2608_v29 }
  0x2c   : > { %2187 = vmatpush3.bf16.msra.mxu0 %v2609_v30 }
  0x2d   : > { %2227 = vmatpush3.bf16.msra.mxu1 %v2610_v31  ;;  %2341 = vmatprep.subr.bf16.mxu0 %v2617_v36 }
  0x2e   : > { %2357 = vmatprep.subr.bf16.mxu1 %v2779_v56 }
  0x2f   : > { %681 = vmatmul.mubr.bf16.vlgmr.msra.gmra.mrb[0].mxu0 %v2611_v32 }
  0x30   : > { %746 = vmatmul.mubr.bf16.vlgmr.msra.gmra.mrb[0].mxu1 %v2614_v34  ;;  %2342 = vmatpush3.bf16.msra.mxu0 %v2617_v36 }
  0x31   : > { %688 = vmatprep.mubr.bf16.mxu0 %v2618_v37  ;;  %753 = vmatprep.mubr.bf16.mxu1 %v2620_v38 }
  0x32   : > { %2343 = vmatprep.subr.bf16.mxu0 %v2624_v39  ;;  %2358 = vmatpush3.bf16.msra.mxu1 %v2644_v58 }
  0x33   : > { %2359 = vmatprep.subr.bf16.mxu1 %v2779_v56 }
  0x34   : > { %2344 = vmatpush3.bf16.msra.mxu0 %v2624_v39 }
  0x35   : > { %2345 = vmatprep.subr.bf16.mxu0 %v2631_v44 }
  0x36   : > { %2360 = vmatpush3.bf16.msra.mxu1 %v2646_v60 }
  0x37   : > { %689 = vmatmul.mubr.bf16.gmra.mrb[4].mxu0 %v2622_v40  ;;  %2361 = vmatprep.subr.bf16.mxu1 %v2779_v56 }
  0x38   : > { %754 = vmatmul.mubr.bf16.gmra.mrb[4].mxu1 %v2623_v41  ;;  %696 = vmatprep.mubr.bf16.mxu0 %v2625_v42 }
  0x39   : > { %761 = vmatprep.mubr.bf16.mxu1 %v2627_v43  ;;  %2346 = vmatpush3.bf16.msra.mxu0 %v2631_v44 }
  0x3a   : > { %2347 = vmatprep.subr.bf16.mxu0 %v2638_v45  ;;  %2362 = vmatpush3.bf16.msra.mxu1 %v2648_v62 }
  0x3b   : > { %2363 = vmatprep.subr.bf16.mxu1 %v2779_v56 }
  0x3d   : > { %2348 = vmatpush3.bf16.msra.mxu0 %v2638_v45 }
  0x3e   : > { %2377 = vmatprep.subr.bf16.mxu0 %v2779_v56  ;;  %2364 = vmatpush3.bf16.msra.mxu1 %v2650_v0 }
  0x3f   : > { %697 = vmatmul.mubr.bf16.gmra.mrb[8].mxu0 %v2629_v46  ;;  %2365 = vmatprep.subr.bf16.mxu1 %v2779_v56 }
  0x40   : > { %762 = vmatmul.mubr.bf16.gmra.mrb[8].mxu1 %v2630_v47  ;;  %704 = vmatprep.mubr.bf16.mxu0 %v2632_v48 }
  0x41   : > { %769 = vmatprep.mubr.bf16.mxu1 %v2634_v49 }
  0x42   : > { %2366 = vmatpush3.bf16.msra.mxu1 %v2652_v2 }
  0x43   : > { %2367 = vmatprep.subr.bf16.mxu1 %v2779_v56 }
  0x46   : > { %2368 = vmatpush3.bf16.msra.mxu1 %v2654_v4 }
  0x47   : > { %705 = vmatmul.mubr.bf16.gmra.mrb[12].mxu0 %v2636_v50  ;;  %2369 = vmatprep.subr.bf16.mxu1 %v2779_v56 }
  0x48   : > { %770 = vmatmul.mubr.bf16.gmra.mrb[12].mxu1 %v2637_v51  ;;  %2349 = vmatprep.mubr.msk.bf16.mxu0 %vm635_vm0, %v2639_v52 }
  0x49   : > { %2373 = vmatprep.mubr.msk.bf16.mxu1 %vm2780_vm1, %v2779_v56 }
  0x4a   : > { %2370 = vmatpush3.bf16.msra.mxu1 %v2656_v6 }
  0x4b   : > { %2371 = vmatprep.subr.bf16.mxu1 %v2779_v56 }
  0x4e   : > { %2372 = vmatpush3.bf16.msra.mxu1 %v2658_v8 }
  0x4f   : > { %2350 = vmatmul.mubr.msk.bf16.vlgmr.msra.gmra.mrb[16].mxu0 %vm635_vm0, %v2640_v53  ;;  %2397 = vmatprep.subr.bf16.mxu1 %v2779_v56 }
  0x50   : > { %2353 = vmatprep.mubr.msk.bf16.mxu0 %vm635_vm0, %v2641_v54  ;;  %2378 = vmatpush3.bf16.msra.mxu0 %v2643_v57 }
  0x51   : > { %2379 = vmatprep.subr.bf16.mxu0 %v2779_v56 }
  0x54   : > { %2380 = vmatpush3.bf16.msra.mxu0 %v2645_v59 }
  0x55   : > { %2381 = vmatprep.subr.bf16.mxu0 %v2779_v56 }
  0x57   : > { %2354 = vmatmul.mubr.msk.bf16.gmra.mrb[20].mxu0 %vm635_vm0, %v2642_v55 }
  0x58   : > { %2382 = vmatpush3.bf16.msra.mxu0 %v2647_v61  ;;  %2393 = vmatprep.mubr.msk.bf16.mxu0 %vm2780_vm1, %v2779_v56 }
  0x59   : > { %2383 = vmatprep.subr.bf16.mxu0 %v2779_v56 }
  0x5c   : > { %2384 = vmatpush3.bf16.msra.mxu0 %v2649_v63 }
  0x5d   : > { %2385 = vmatprep.subr.bf16.mxu0 %v2779_v56 }
  0x60   : > { %2386 = vmatpush3.bf16.msra.mxu0 %v2651_v1 }
  0x61   : > { %2387 = vmatprep.subr.bf16.mxu0 %v2779_v56 }
  0x64   : > { %2388 = vmatpush3.bf16.msra.mxu0 %v2653_v3 }
  0x65   : > { %2389 = vmatprep.subr.bf16.mxu0 %v2779_v56 }
  0x68   : > { %2390 = vmatpush3.bf16.msra.mxu0 %v2655_v5 }
  0x69   : > { %2391 = vmatprep.subr.bf16.mxu0 %v2779_v56 }
  0x6c   : > { %2392 = vmatpush3.bf16.msra.mxu0 %v2657_v7 }
  0x6d   : > { %2417 = vmatprep.subr.bf16.mxu0 %v2779_v56 }
 0x102   : > { %v2188_v9 = vpop.f32.mrb[0].mxu0 }
 0x103   : > { %v2228_v10 = vpop.f32.mrb[0].mxu1  ;;  %v2189_v11 = vpop.f32.mrb[1].mxu0 }
 0x104   : > { %v2190_v12 = vadd.f32 %v2189_v11, %v2188_v9  ;;  %v2229_v13 = vpop.f32.mrb[1].mxu1  ;;  %v2191_v14 = vpop.f32.mrb[2].mxu0 }
 0x105   : > { %v2230_v15 = vadd.f32 %v2229_v13, %v2228_v10  ;;  %v2231_v16 = vpop.f32.mrb[2].mxu1  ;;  %v2192_v17 = vpop.f32.mrb[3].mxu0 }
 0x106   : > { %v2193_v18 = vadd.f32 %v2192_v17, %v2191_v14  ;;  %v2232_v19 = vpop.f32.mrb[3].mxu1 }
 0x107   : > { %v2233_v20 = vadd.f32 %v2232_v19, %v2231_v16  ;;  %v748_v21 = vadd.f32 %v2230_v15, %v2190_v12 }
 0x109   : > { %v751_v22 = vadd.f32 %v2233_v20, %v2193_v18 }
 0x10a   : > { %v2194_v23 = vpop.f32.mrb[4].mxu0 }
 0x10b   : > { %v2234_v24 = vpop.f32.mrb[4].mxu1  ;;  %v2195_v25 = vpop.f32.mrb[5].mxu0 }
 0x10c   : > { %v2196_v26 = vadd.f32 %v2195_v25, %v2194_v23  ;;  %v2235_v27 = vpop.f32.mrb[5].mxu1  ;;  %v2197_v28 = vpop.f32.mrb[6].mxu0  ;;  %v1968_v23 = vld [vmem:[%s3374_s2] ss:$0 sm:$0xff] }
 0x10d   : > { %v2236_v29 = vadd.f32 %v2235_v27, %v2234_v24  ;;  %v2237_v30 = vpop.f32.mrb[6].mxu1  ;;  %v2198_v31 = vpop.f32.mrb[7].mxu0 }
 0x10e   : > { %v2199_v32 = vadd.f32 %v2198_v31, %v2197_v28  ;;  %v2238_v33 = vpop.f32.mrb[7].mxu1  ;;  %v2660_v31 = vld [vmem:[%s3375_s3 + $0x80] sm:$0xff]  }
 0x10f   : > { %v2239_v34 = vadd.f32 %v2238_v33, %v2237_v30  ;;  %v756_v35 = vadd.f32 %v2236_v29, %v2196_v26  ;;  %v2659_v29 = vld [vmem:[%s3375_s3 + $0xc0] sm:$0xff]   ;;  %v2661_v33 = vld [vmem:[%s3375_s3 + $0xc8] sm:$0xff]  }
 0x111   : > { %v759_v36 = vadd.f32 %v2239_v34, %v2199_v32  ;;  %v2662_v34 = vld [vmem:[%s3375_s3 + $0x88] sm:$0xff]  }
 0x112   : > { %v2200_v37 = vpop.f32.mrb[8].mxu0 }
 0x113   : > { %v2240_v38 = vpop.f32.mrb[8].mxu1  ;;  %v2201_v39 = vpop.f32.mrb[9].mxu0 }
 0x114   : > { %v2202_v40 = vadd.f32 %v2201_v39, %v2200_v37  ;;  %v2241_v41 = vpop.f32.mrb[9].mxu1  ;;  %v2203_v42 = vpop.f32.mrb[10].mxu0  ;;  %v2665_v37 = vld [vmem:[%s3375_s3 + $0xd8] sm:$0xff]   ;;  %v2667_v39 = vld [vmem:[%s3375_s3 + $0xe0] sm:$0xff]  }
 0x115   : > { %v2242_v43 = vadd.f32 %v2241_v41, %v2240_v38  ;;  %v2243_v44 = vpop.f32.mrb[10].mxu1  ;;  %v2204_v45 = vpop.f32.mrb[11].mxu0  ;;  %v2666_v38 = vld [vmem:[%s3375_s3 + $0x98] sm:$0xff]   ;;  %v2669_v41 = vld [vmem:[%s3375_s3 + $0xe8] sm:$0xff]  }
 0x116   : > { %v2205_v46 = vadd.f32 %v2204_v45, %v2203_v42  ;;  %v2244_v47 = vpop.f32.mrb[11].mxu1  ;;  %v2670_v42 = vld [vmem:[%s3375_s3 + $0xa8] sm:$0xff]   ;;  %v2673_v45 = vld [vmem:[%s3375_s3 + $0xf8] sm:$0xff]  }
 0x117   : > { %v2245_v48 = vadd.f32 %v2244_v47, %v2243_v44  ;;  %v764_v49 = vadd.f32 %v2242_v43, %v2202_v40  ;;  %v2668_v40 = vld [vmem:[%s3375_s3 + $0xa0] sm:$0xff]   ;;  %v2671_v43 = vld [vmem:[%s3375_s3 + $0xf0] sm:$0xff]  }
 0x118   : > { %v2672_v44 = vld [vmem:[%s3375_s3 + $0xb0] sm:$0xff]   ;;  %v2675_v47 = vld [vmem:[%s3375_s3 + $0x140] sm:$0xff]  }
 0x119   : > { %v767_v50 = vadd.f32 %v2245_v48, %v2205_v46  ;;  %v2674_v46 = vld [vmem:[%s3375_s3 + $0xb8] sm:$0xff]  }
 0x11a   : > { %v2206_v51 = vpop.f32.mrb[12].mxu0 }
 0x11b   : > { %v2246_v52 = vpop.f32.mrb[12].mxu1  ;;  %v2207_v53 = vpop.f32.mrb[13].mxu0 }
 0x11c   : > { %v2208_v54 = vadd.f32 %v2207_v53, %v2206_v51  ;;  %v2247_v55 = vpop.f32.mrb[13].mxu1  ;;  %v2209_v57 = vpop.f32.mrb[14].mxu0  ;;  %v2677_v51 = vld [vmem:[%s3375_s3 + $0x148] sm:$0xff]   ;;  %v2679_v53 = vld [vmem:[%s3375_s3 + $0x150] sm:$0xff]  }
 0x11d   : > { %v2248_v58 = vadd.f32 %v2247_v55, %v2246_v52  ;;  %v2249_v59 = vpop.f32.mrb[14].mxu1  ;;  %v2210_v60 = vpop.f32.mrb[15].mxu0  ;;  %v2678_v52 = vld [vmem:[%s3375_s3 + $0x108] sm:$0xff]   ;;  %v2681_v55 = vld [vmem:[%s3375_s3 + $0x158] sm:$0xff]  }
 0x11e   : > { %v2211_v61 = vadd.f32 %v2210_v60, %v2209_v57  ;;  %v2250_v62 = vpop.f32.mrb[15].mxu1  ;;  %v2682_v57 = vld [vmem:[%s3375_s3 + $0x118] sm:$0xff]   ;;  %v2685_v60 = vld [vmem:[%s3375_s3 + $0x168] sm:$0xff]  }
 0x11f   : > { %v2251_v63 = vadd.f32 %v2250_v62, %v2249_v59  ;;  %v772_v0 = vadd.f32 %v2248_v58, %v2208_v54  ;;  %v2680_v54 = vld [vmem:[%s3375_s3 + $0x110] sm:$0xff]   ;;  %v2683_v58 = vld [vmem:[%s3375_s3 + $0x160] sm:$0xff]  }
 0x120   : > { %v2684_v59 = vld [vmem:[%s3375_s3 + $0x120] sm:$0xff]   ;;  %v2687_v62 = vld [vmem:[%s3375_s3 + $0x170] sm:$0xff]  }
 0x121   : > { %v775_v1 = vadd.f32 %v2251_v63, %v2211_v61  ;;  %v2686_v61 = vld [vmem:[%s3375_s3 + $0x128] sm:$0xff]   ;;  %v2688_v63 = vld [vmem:[%s3375_s3 + $0x130] sm:$0xff]  }
 0x122   : > { %v2351_v2 = vpop.f32.mrb[16].mxu0 }
 0x123   : > { %v821_v3 = vadd.f32 %v2351_v2, %v756_v35  ;;  %v812_v4 = vpop.f32.mrb[17].mxu0  ;;  %v2663_v35 = vld [vmem:[%s3375_s3 + $0xd0] sm:$0xff]   ;;  %v2691_v2 = vld [vmem:[%s3375_s3 + $0x1c0] sm:$0xff]  }
 0x124   : > { %v813_v5 = vadd.f32 %v812_v4, %v748_v21  ;;  %v2352_v6 = vpop.f32.mrb[18].mxu0  ;;  %v2692_v4 = vld [vmem:[%s3375_s3 + $0x180] sm:$0xff]  }
 0x125   : > { %v824_v7 = vadd.f32 %v2352_v6, %v759_v36  ;;  %v815_v8 = vpop.f32.mrb[19].mxu0  ;;  %v2664_v36 = vld [vmem:[%s3375_s3 + $0x90] sm:$0xff]   ;;  %v2693_v6 = vld [vmem:[%s3375_s3 + $0x1c8] sm:$0xff]  }
 0x126   : > { %v843_v9 = vmax.f32 %v813_v5, %v821_v3  ;;  %v816_v10 = vadd.f32 %v815_v8, %v751_v22  ;;  %v2695_v8 = vld [vmem:[%s3375_s3 + $0x1d0] sm:$0xff]  }
 0x128   : > { %v844_v11 = vmax.f32 %v816_v10, %v824_v7  ;;  %v2694_v7 = vld [vmem:[%s3375_s3 + $0x188] sm:$0xff]   ;;  %v2697_v10 = vld [vmem:[%s3375_s3 + $0x1d8] sm:$0xff]  }
 0x12a   : > { %v2355_v12 = vpop.f32.mrb[20].mxu0 }
 0x12b   : > { %v837_v13 = vadd.f32 %v2355_v12, %v772_v0  ;;  %v828_v14 = vpop.f32.mrb[21].mxu0  ;;  %v2689_v0 = vld [vmem:[%s3375_s3 + $0x178] sm:$0xff]   ;;  %v2699_v12 = vld [vmem:[%s3375_s3 + $0x1e0] sm:$0xff]  }
 0x12c   : > { %v829_v15 = vadd.f32 %v828_v14, %v764_v49  ;;  %v2356_v16 = vpop.f32.mrb[22].mxu0  ;;  %v2676_v49 = vld [vmem:[%s3375_s3 + $0x100] sm:$0xff]   ;;  %v2701_v14 = vld [vmem:[%s3375_s3 + $0x1e8] sm:$0xff]  }
 0x12d   : > { %v840_v17 = vadd.f32 %v2356_v16, %v775_v1  ;;  %v831_v18 = vpop.f32.mrb[23].mxu0  ;;  %v2690_v1 = vld [vmem:[%s3375_s3 + $0x138] sm:$0xff]   ;;  %v2703_v16 = vld [vmem:[%s3375_s3 + $0x1f0] sm:$0xff]  }
 0x12e   : > { %v845_v19 = vmax.f32 %v829_v15, %v837_v13  ;;  %v832_v20 = vadd.f32 %v831_v18, %v767_v50  ;;  %v2700_v13 = vld [vmem:[%s3375_s3 + $0x1a0] sm:$0xff]   ;;  %v2702_v15 = vld [vmem:[%s3375_s3 + $0x1a8] sm:$0xff]   ;;  %v2705_v18 = vld [vmem:[%s3375_s3 + $0x1f8] sm:$0xff]  }
 0x130   : > { %v847_v21 = vmax.f32 %v843_v9, %v845_v19  ;;  %v846_v24 = vmax.f32 %v832_v20, %v840_v17  ;;  %v2696_v9 = vld [vmem:[%s3375_s3 + $0x190] sm:$0xff]   ;;  %v2706_v19 = vld [vmem:[%s3375_s3 + $0x1b8] sm:$0xff]  }
 0x131   : > { %v2704_v17 = vld [vmem:[%s3375_s3 + $0x1b0] sm:$0xff]  }
 0x132   : > { %v856_v25 = vadd.f32 %v1968_v23, %v847_v21  ;;  %v848_v26 = vmax.f32 %v844_v11, %v846_v24  ;;  %v2698_v11 = vld [vmem:[%s3375_s3 + $0x198] sm:$0xff]   ;;  %v2708_v24 = vld [vmem:[%s3375_s3 + $0x208] sm:$0xff]  }
 0x134   : > { %v857_v27 = vadd.f32 %v1968_v23, %v848_v26  ;;  %v858_v22 = vmax.f32 %v856_v25, 0.0  ;;  %v2707_v23 = vld [vmem:[%s3375_s3 + $0x200] sm:$0xff]   ;;  %v2709_v25 = vld [vmem:[%s3375_s3 + $0x210] sm:$0xff]   ;;  %v2710_v26 = vld [vmem:[%s3375_s3 + $0x218] sm:$0xff]  }
 0x136   : > { %v859_v28 = vmax.f32 %v857_v27, 0.0  ;;  %v2711_v27 = vld [vmem:[%s3375_s3 + $0x220] sm:$0xff]  }
 0x138   : > { %v3075_v30 = vpack.c.bf16 %v859_v28, %v858_v22  ;;  %v2712_v22 = vld [vmem:[%s3375_s3 + $0x228] sm:$0xff]   ;;  %v2713_v28 = vld [vmem:[%s3375_s3 + $0x230] sm:$0xff]  }
 0x13a   : > { %2394 = vmatmul.mubr.bf16.vlgmr.msra.gmra.mrb[24].mxu0 %v3075_v30  ;;  %v3082_v32 = vshrl.u32 %v3075_v30, 16  ;;  %v1092_v50 = vrot.slane %v3075_v30, 1  ;;  %v1308_v5 = vrot.slane %v3075_v30, 2  ;;  %v1524_v21 = vrot.slane %v3075_v30, 3 }
 0x13b   : > { %2418 = vmatpush3.bf16.msra.mxu0 %v2659_v29  ;;  %2433 = vmatprep.mubr.msk.bf16.mxu0 %vm2780_vm1, %v2779_v56  ;;  %v2714_v29 = vld [vmem:[%s3375_s3 + $0x238] sm:$0xff]  }
 0x13c   : > { %2374 = vmatmul.mubr.bf16.vlgmr.msra.gmra.mrb[16].mxu1 %v3082_v32  ;;  %2419 = vmatprep.subr.bf16.mxu0 %v2779_v56  ;;  %v1200_v48 = vrot.slane %v3082_v32, 1  ;;  %v1416_v3 = vrot.slane %v3082_v32, 2  ;;  %v1632_v20 = vrot.slane %v3082_v32, 3 }
 0x13d   : > { %2398 = vmatpush3.bf16.msra.mxu1 %v2660_v31  ;;  %2413 = vmatprep.mubr.msk.bf16.mxu1 %vm2780_vm1, %v2779_v56  ;;  %v1740_v31 = vrot.slane %v3075_v30, 4 }
 0x13e   : > { %2399 = vmatprep.subr.bf16.mxu1 %v2779_v56 }
 0x13f   : > { %2420 = vmatpush3.bf16.msra.mxu0 %v2661_v33 }
 0x140   : > { %2421 = vmatprep.subr.bf16.mxu0 %v2779_v56 }
 0x141   : > { %2400 = vmatpush3.bf16.msra.mxu1 %v2662_v34 }
 0x142   : > { %2401 = vmatprep.subr.bf16.mxu1 %v2779_v56 }
 0x143   : > { %2422 = vmatpush3.bf16.msra.mxu0 %v2663_v35 }
 0x144   : > { %2423 = vmatprep.subr.bf16.mxu0 %v2779_v56 }
 0x145   : > { %2402 = vmatpush3.bf16.msra.mxu1 %v2664_v36 }
 0x146   : > { %2403 = vmatprep.subr.bf16.mxu1 %v2779_v56 }
 0x147   : > { %2424 = vmatpush3.bf16.msra.mxu0 %v2665_v37 }
 0x148   : > { %2425 = vmatprep.subr.bf16.mxu0 %v2779_v56 }
 0x149   : > { %2404 = vmatpush3.bf16.msra.mxu1 %v2666_v38 }
 0x14a   : > { %2405 = vmatprep.subr.bf16.mxu1 %v2779_v56 }
 0x14b   : > { %2426 = vmatpush3.bf16.msra.mxu0 %v2667_v39 }
 0x14c   : > { %2427 = vmatprep.subr.bf16.mxu0 %v2779_v56 }
 0x14d   : > { %2406 = vmatpush3.bf16.msra.mxu1 %v2668_v40 }
 0x14e   : > { %2407 = vmatprep.subr.bf16.mxu1 %v2779_v56 }
 0x14f   : > { %2428 = vmatpush3.bf16.msra.mxu0 %v2669_v41 }
 0x150   : > { %2429 = vmatprep.subr.bf16.mxu0 %v2779_v56 }
 0x151   : > { %2408 = vmatpush3.bf16.msra.mxu1 %v2670_v42 }
 0x152   : > { %2409 = vmatprep.subr.bf16.mxu1 %v2779_v56 }
 0x153   : > { %2430 = vmatpush3.bf16.msra.mxu0 %v2671_v43 }
 0x154   : > { %2431 = vmatprep.subr.bf16.mxu0 %v2779_v56 }
 0x155   : > { %2410 = vmatpush3.bf16.msra.mxu1 %v2672_v44 }
 0x156   : > { %2411 = vmatprep.subr.bf16.mxu1 %v2779_v56 }
 0x157   : > { %2432 = vmatpush3.bf16.msra.mxu0 %v2673_v45 }
 0x158   : > { %2457 = vmatprep.subr.bf16.mxu0 %v2779_v56 }
 0x159   : > { %2412 = vmatpush3.bf16.msra.mxu1 %v2674_v46 }
 0x15a   : > { %2434 = vmatmul.mubr.bf16.vlgmr.msra.gmra.mrb[28].mxu0 %v1200_v48  ;;  %2437 = vmatprep.subr.bf16.mxu1 %v2779_v56 }
 0x15b   : > { %2458 = vmatpush3.bf16.msra.mxu0 %v2675_v47  ;;  %2473 = vmatprep.mubr.msk.bf16.mxu0 %vm2780_vm1, %v2779_v56 }
 0x15c   : > { %2414 = vmatmul.mubr.bf16.vlgmr.msra.gmra.mrb[20].mxu1 %v1092_v50  ;;  %2459 = vmatprep.subr.bf16.mxu0 %v2779_v56 }
 0x15d   : > { %2438 = vmatpush3.bf16.msra.mxu1 %v2676_v49  ;;  %2453 = vmatprep.mubr.msk.bf16.mxu1 %vm2780_vm1, %v2779_v56 }
 0x15e   : > { %2439 = vmatprep.subr.bf16.mxu1 %v2779_v56 }
 0x15f   : > { %2460 = vmatpush3.bf16.msra.mxu0 %v2677_v51 }
 0x160   : > { %2461 = vmatprep.subr.bf16.mxu0 %v2779_v56 }
 0x161   : > { %2440 = vmatpush3.bf16.msra.mxu1 %v2678_v52 }
 0x162   : > { %2441 = vmatprep.subr.bf16.mxu1 %v2779_v56 }
 0x163   : > { %2462 = vmatpush3.bf16.msra.mxu0 %v2679_v53 }
 0x164   : > { %2463 = vmatprep.subr.bf16.mxu0 %v2779_v56 }
 0x165   : > { %2442 = vmatpush3.bf16.msra.mxu1 %v2680_v54 }
 0x166   : > { %2443 = vmatprep.subr.bf16.mxu1 %v2779_v56 }
 0x167   : > { %2464 = vmatpush3.bf16.msra.mxu0 %v2681_v55 }
 0x168   : > { %2465 = vmatprep.subr.bf16.mxu0 %v2779_v56 }
 0x169   : > { %2444 = vmatpush3.bf16.msra.mxu1 %v2682_v57 }
 0x16a   : > { %2445 = vmatprep.subr.bf16.mxu1 %v2779_v56 }
 0x16b   : > { %2466 = vmatpush3.bf16.msra.mxu0 %v2683_v58 }
 0x16c   : > { %2467 = vmatprep.subr.bf16.mxu0 %v2779_v56 }
 0x16d   : > { %2446 = vmatpush3.bf16.msra.mxu1 %v2684_v59 }
 0x16e   : > { %2447 = vmatprep.subr.bf16.mxu1 %v2779_v56 }
 0x16f   : > { %2468 = vmatpush3.bf16.msra.mxu0 %v2685_v60 }
 0x170   : > { %2469 = vmatprep.subr.bf16.mxu0 %v2779_v56 }
 0x171   : > { %2448 = vmatpush3.bf16.msra.mxu1 %v2686_v61 }
 0x172   : > { %2449 = vmatprep.subr.bf16.mxu1 %v2779_v56 }
 0x173   : > { %2470 = vmatpush3.bf16.msra.mxu0 %v2687_v62 }
 0x174   : > { %2471 = vmatprep.subr.bf16.mxu0 %v2779_v56 }
 0x175   : > { %2450 = vmatpush3.bf16.msra.mxu1 %v2688_v63 }
 0x176   : > { %2451 = vmatprep.subr.bf16.mxu1 %v2779_v56 }
 0x177   : > { %2472 = vmatpush3.bf16.msra.mxu0 %v2689_v0 }
 0x178   : > { %2497 = vmatprep.subr.bf16.mxu0 %v2779_v56 }
 0x179   : > { %2452 = vmatpush3.bf16.msra.mxu1 %v2690_v1 }
 0x17a   : > { %2474 = vmatmul.mubr.bf16.vlgmr.msra.gmra.mrb[32].mxu0 %v1416_v3  ;;  %2477 = vmatprep.subr.bf16.mxu1 %v2779_v56 }
 0x17b   : > { %2498 = vmatpush3.bf16.msra.mxu0 %v2691_v2  ;;  %2513 = vmatprep.mubr.msk.bf16.mxu0 %vm2780_vm1, %v2779_v56 }
 0x17c   : > { %2454 = vmatmul.mubr.bf16.vlgmr.msra.gmra.mrb[24].mxu1 %v1308_v5  ;;  %2499 = vmatprep.subr.bf16.mxu0 %v2779_v56 }
 0x17d   : > { %2478 = vmatpush3.bf16.msra.mxu1 %v2692_v4  ;;  %2493 = vmatprep.mubr.msk.bf16.mxu1 %vm2780_vm1, %v2779_v56 }
 0x17e   : > { %2479 = vmatprep.subr.bf16.mxu1 %v2779_v56 }
 0x17f   : > { %2500 = vmatpush3.bf16.msra.mxu0 %v2693_v6 }
 0x180   : > { %2501 = vmatprep.subr.bf16.mxu0 %v2779_v56 }
 0x181   : > { %2480 = vmatpush3.bf16.msra.mxu1 %v2694_v7  ;;  %v1831_v7 = vld [vmem:[%s3376_s4] sm:$0x1] }
 0x182   : > { %2481 = vmatprep.subr.bf16.mxu1 %v2779_v56 }
 0x183   : > { %2502 = vmatpush3.bf16.msra.mxu0 %v2695_v8 }
 0x184   : > { %2503 = vmatprep.subr.bf16.mxu0 %v2779_v56 }
 0x185   : > { %2482 = vmatpush3.bf16.msra.mxu1 %v2696_v9 }
 0x186   : > { %2483 = vmatprep.subr.bf16.mxu1 %v2779_v56 }
 0x187   : > { %2504 = vmatpush3.bf16.msra.mxu0 %v2697_v10 }
 0x188   : > { %2505 = vmatprep.subr.bf16.mxu0 %v2779_v56 }
 0x189   : > { %2484 = vmatpush3.bf16.msra.mxu1 %v2698_v11 }
 0x18a   : > { %2485 = vmatprep.subr.bf16.mxu1 %v2779_v56 }
 0x18b   : > { %2506 = vmatpush3.bf16.msra.mxu0 %v2699_v12 }
 0x18c   : > { %2507 = vmatprep.subr.bf16.mxu0 %v2779_v56 }
 0x18d   : > { %2486 = vmatpush3.bf16.msra.mxu1 %v2700_v13 }
 0x18e   : > { %2487 = vmatprep.subr.bf16.mxu1 %v2779_v56 }
 0x18f   : > { %2508 = vmatpush3.bf16.msra.mxu0 %v2701_v14 }
 0x190   : > { %2509 = vmatprep.subr.bf16.mxu0 %v2779_v56 }
 0x191   : > { %2488 = vmatpush3.bf16.msra.mxu1 %v2702_v15 }
 0x192   : > { %2489 = vmatprep.subr.bf16.mxu1 %v2779_v56 }
 0x193   : > { %2510 = vmatpush3.bf16.msra.mxu0 %v2703_v16 }
 0x194   : > { %2511 = vmatprep.subr.bf16.mxu0 %v2779_v56 }
 0x195   : > { %2490 = vmatpush3.bf16.msra.mxu1 %v2704_v17 }
 0x196   : > { %2491 = vmatprep.subr.bf16.mxu1 %v2779_v56 }
 0x197   : > { %2512 = vmatpush3.bf16.msra.mxu0 %v2705_v18 }
 0x199   : > { %2492 = vmatpush3.bf16.msra.mxu1 %v2706_v19 }
 0x19a   : > { %2514 = vmatmul.mubr.bf16.vlgmr.msra.gmra.mrb[36].mxu0 %v1632_v20  ;;  %2517 = vmatprep.subr.bf16.mxu1 %v2779_v56 }
 0x19c   : > { %2494 = vmatmul.mubr.bf16.vlgmr.msra.gmra.mrb[28].mxu1 %v1524_v21 }
 0x19d   : > { %2518 = vmatpush3.bf16.msra.mxu1 %v2707_v23  ;;  %2533 = vmatprep.mubr.msk.bf16.mxu1 %vm2780_vm1, %v2779_v56 }
 0x19e   : > { %2519 = vmatprep.subr.bf16.mxu1 %v2779_v56 }
 0x1a1   : > { %2520 = vmatpush3.bf16.msra.mxu1 %v2708_v24 }
 0x1a2   : > { %2521 = vmatprep.subr.bf16.mxu1 %v2779_v56 }
 0x1a5   : > { %2522 = vmatpush3.bf16.msra.mxu1 %v2709_v25 }
 0x1a6   : > { %2523 = vmatprep.subr.bf16.mxu1 %v2779_v56 }
 0x1a9   : > { %2524 = vmatpush3.bf16.msra.mxu1 %v2710_v26 }
 0x1aa   : > { %2525 = vmatprep.subr.bf16.mxu1 %v2779_v56 }
 0x1ad   : > { %2526 = vmatpush3.bf16.msra.mxu1 %v2711_v27 }
 0x1ae   : > { %2527 = vmatprep.subr.bf16.mxu1 %v2779_v56 }
 0x1b1   : > { %2528 = vmatpush3.bf16.msra.mxu1 %v2712_v22 }
 0x1b2   : > { %2529 = vmatprep.subr.bf16.mxu1 %v2779_v56 }
 0x1b5   : > { %2530 = vmatpush3.bf16.msra.mxu1 %v2713_v28 }
 0x1b6   : > { %2531 = vmatprep.subr.bf16.mxu1 %v2779_v56 }
 0x1b9   : > { %2532 = vmatpush3.bf16.msra.mxu1 %v2714_v29 }
 0x1bc   : > { %2534 = vmatmul.mubr.bf16.vlgmr.msra.gmra.mrb[32].mxu1 %v1740_v31 }
 0x20d   : > { %v1068_v32 = vpop.f32.mrb[24].mxu0 }
 0x20e   : > { %v2395_v33 = vpop.f32.mrb[25].mxu0 }
 0x20f   : > { %v980_v34 = vpop.f32.mrb[16].mxu1  ;;  %v1071_v35 = vpop.f32.mrb[26].mxu0 }
 0x210   : > { %v1069_v36 = vadd.f32 %v1068_v32, %v980_v34  ;;  %v2375_v37 = vpop.f32.mrb[17].mxu1  ;;  %v2396_v38 = vpop.f32.mrb[27].mxu0 }
 0x211   : > { %v983_v39 = vpop.f32.mrb[18].mxu1 }
 0x212   : > { %v2376_v40 = vpop.f32.mrb[19].mxu1 }
 0x22d   : > { %v1284_v41 = vpop.f32.mrb[28].mxu0 }
 0x22e   : > { %v2435_v42 = vpop.f32.mrb[29].mxu0 }
 0x22f   : > { %v1176_v43 = vpop.f32.mrb[20].mxu1  ;;  %v1287_v44 = vpop.f32.mrb[30].mxu0 }
 0x230   : > { %v1182_v45 = vadd.f32 %v1176_v43, %v1069_v36  ;;  %v2415_v46 = vpop.f32.mrb[21].mxu1  ;;  %v2436_v56 = vpop.f32.mrb[31].mxu0 }
 0x231   : > { %v1179_v47 = vpop.f32.mrb[22].mxu1 }
 0x232   : > { %v2416_v48 = vpop.f32.mrb[23].mxu1  ;;  %v1290_v30 = vadd.f32 %v1284_v41, %v1182_v45 }
 0x24d   : > { %v1500_v49 = vpop.f32.mrb[32].mxu0 }
 0x24e   : > { %v2475_v50 = vpop.f32.mrb[33].mxu0 }
 0x24f   : > { %v1392_v51 = vpop.f32.mrb[24].mxu1  ;;  %v1503_v52 = vpop.f32.mrb[34].mxu0 }
 0x250   : > { %v1398_v53 = vadd.f32 %v1392_v51, %v1290_v30  ;;  %v2455_v54 = vpop.f32.mrb[25].mxu1  ;;  %v2476_v55 = vpop.f32.mrb[35].mxu0 }
 0x251   : > { %v1395_v57 = vpop.f32.mrb[26].mxu1 }
 0x252   : > { %v2456_v58 = vpop.f32.mrb[27].mxu1  ;;  %v1506_v59 = vadd.f32 %v1500_v49, %v1398_v53 }
 0x26d   : > { %v1716_v60 = vpop.f32.mrb[36].mxu0 }
 0x26e   : > { %v2515_v61 = vpop.f32.mrb[37].mxu0 }
 0x26f   : > { %v1608_v62 = vpop.f32.mrb[28].mxu1  ;;  %v1719_v63 = vpop.f32.mrb[38].mxu0 }
 0x270   : > { %v1614_v0 = vadd.f32 %v1608_v62, %v1506_v59  ;;  %v2495_v1 = vpop.f32.mrb[29].mxu1  ;;  %v2516_v2 = vpop.f32.mrb[39].mxu0 }
 0x271   : > { %v1611_v3 = vpop.f32.mrb[30].mxu1 }
 0x272   : > { %v2496_v4 = vpop.f32.mrb[31].mxu1  ;;  %v1722_v5 = vadd.f32 %v1716_v60, %v1614_v0 }
 0x28f   : > { %v1824_v6 = vpop.f32.mrb[32].mxu1 }
 0x290   : > { %v1830_v8 = vadd.f32 %v1824_v6, %v1722_v5  ;;  %v2535_v9 = vpop.f32.mrb[33].mxu1 }
 0x291   : > { %v1827_v10 = vpop.f32.mrb[34].mxu1 }
 0x292   : > { %v1832_v11 = vadd.f32 %v1831_v7, %v1830_v8  ;;  %v2536_v12 = vpop.f32.mrb[35].mxu1 }
 0x294   : > { %1834 = vst.msk [vmem:[%s216_s8] sm:$0x1] %vm1833_vm2, %v1832_v11 }
 0x295   : > { %2728 = shalt.err (!%p2725_p3)
}
 0x296   : > { %s2729_s23 = scalar_lea.hbm %s3330_s12, 16  ;;  %s2733_s26 = scalar_lea.hbm %s3377_s5, 32 }
 0x297   : > { %p2730_p4 = scmp.ne.s32.totalorder %s3330_s12, %s2729_s23  ;;  %p2734_p9 = scmp.lt.u32.totalorder %s3330_s12, %s3377_s5 }
 0x298   : > { %p2735_p10 = scmp.lt.u32.totalorder %s2733_s26, %s2729_s23  ;;  %p2737_p12 = scmp.lt.u32.totalorder %s2729_s23, %s3330_s12 }
 0x299   : > { %p2731_p7 = pnand %p2730_p4, %p2850_p5 }
 0x29a   : > { %p2736_p11 = por %p2735_p10, %p2734_p9 }
 0x29b   : > { %p2732_p8 = pneg %p2731_p7 }
 0x29c   : > { %p2738_p13 = por %p2737_p12, %p2736_p11 }
 0x29e   : > { %p2739_p0 = pnand %p2738_p13, %p2732_p8 }
 0x2a0   : > { %2742 = shalt.err (!%p2739_p0)
}
 0x2a1   : > { %2538 = dma.vmem_to_hbm [thread:$0]  (%p2850_p5), %s3332_s9, 16, %s3330_s12, %s1836_s22  }
 0x2a2 PF: > { %p2544_p1 = scmp.ge.s32.totalorder %s2777_s21, 2  ;;  %s1860_s7 = sand.u32 1, %s2765_s18  }
 0x2a3   : > { %s1861_s8 = scalar_lea.sflag [#allocation3], %s1860_s7 }
 0x2a4   : > { %p2541_p2 = pnand %p2544_p1, %p2854_p6 }
 0x2a6   : > { %2760 = dma.done.wait (!%p2541_p2), %s1861_s8, 16  }
 0x2a7   : > { %2762 = vsyncadd (!%p2541_p2), %s1861_s8, 4294967280  ;;  %p15_p3 = scmp.ge.s32.totalorder %s2837_s24, 4   ;;  %s3380_s18 = smov %s2769_s19 }
 0x2a8   : > { %s3381_s19 = smov %s2773_s20  ;;  %s3382_s20 = smov %s2848_s27 }
 0x2a9   : > { %s3383_s21 = smov %s2837_s24  ;;  %17 = sbr.rel (!%p15_p3) target bundleno = 3 (0x3), region = 83 }
 0x2b0   :  { %1865 = vsyncpa [#allocation3], 1 }
 0x2b1   :  { %1867 = vsyncpa [#allocation3 + $0x1], 1 }

</bundles_post_ra>
